<compile_context>
chip_gen: v5e
topology: v5e:2x2
jax: 0.10.0
libtpu: 0.0.40
codegen_flags: <defaults>
</compile_context>

<pallas_src>
import functools

import numpy as np

import jax
import jax.numpy as jnp
from jax import lax
from jax.experimental import pallas as pl
from jax.experimental.pallas import tpu as pltpu

BN_EPS = 1e-5


# ----------------------------------------------------------------------------
# Generation-aware defaults (VMEM budget, depthwise compute dtype)
# ----------------------------------------------------------------------------
def _tpu_kind():
    try:
        dev = jax.devices()[0]
        if dev.platform != "tpu":
            return ""
        return dev.device_kind.lower()
    except Exception:
        return ""


def _vmem_budget_bytes():
    kind = _tpu_kind()
    if "7x" in kind or "v7" in kind:
        return 48 * 1024 * 1024          # v7x: 64 MiB physical -> leave headroom
    if "v6" in kind or "v5e" in kind or "v5 lite" in kind or "v5lite" in kind:
        return 96 * 1024 * 1024          # 128 MiB physical
    if "v2" in kind or "v3" in kind:
        return 12 * 1024 * 1024
    return 64 * 1024 * 1024              # v4 / v5p / unknown: conservative


def _default_compute_dtype():
    kind = _tpu_kind()
    if "v6" in kind or "7x" in kind or "v7" in kind:
        return jnp.bfloat16              # bf16-native VPU/EUP
    return jnp.float32                   # v5e and older: no bf16 VALU/EUP


# ----------------------------------------------------------------------------
# Pallas kernel: one group of batch_tile images per grid step.
# Per-group layout inside the kernel: (channels, batch_tile*H*W) = sublanes x lanes.
# ----------------------------------------------------------------------------
def _mv2_kernel(x_ref, w1_ref, b1_ref, wdw_ref, b2_ref, w3_ref, b3_ref,
                mask_ref, o_ref, *, W, L, use_res, compute_dtype):
    x = x_ref[0]                                   # (Cin, L), lane-dense
    w1 = w1_ref[...]                               # (Hd, Cin)   BN1 folded
    w3 = w3_ref[...]                               # (Cout, Hd)  BN3 folded
    b1 = b1_ref[...]                               # (Hd, 1)  f32
    b2 = b2_ref[...]                               # (Hd, 1)  compute_dtype
    b3 = b3_ref[...]                               # (Cout, 1) f32
    taps = [wdw_ref[t] for t in range(9)]          # (Hd, 1) each, BN2 folded
    m_cl = mask_ref[pl.ds(0, 1), :]                # col tap b=-1 valid (c >= 1)
    m_cr = mask_ref[pl.ds(1, 1), :]                # col tap b=+1 valid (c <= W-2)
    m_rt = mask_ref[pl.ds(2, 1), :]                # row tap a=-1 valid (r >= 1)
    m_rb = mask_ref[pl.ds(3, 1), :]                # row tap a=+1 valid (r <= H-2)

    # --- 1x1 expand conv: ONE MXU matmul over all batch_tile images ---
    h = jnp.dot(w1, x.astype(w1.dtype), preferred_element_type=jnp.float32)
    h = h + b1
    # SiLU: sigmoid runs on the EUP (free slot); keep it, don't polynomialize.
    h = (h * jax.nn.sigmoid(h)).astype(compute_dtype)         # (Hd, L)

    # --- 3x3 depthwise conv, stride 1, pad 1 (lane rolls + factored masks) ---
    # pltpu.roll(v, s, 1)[p] == v[p - s].  Column masks only depend on the
    # column index, which is invariant under row shifts (multiples of W), so we
    # mask the two column-shifted copies once and reuse them for all 3 rows.
    d_m = pltpu.roll(h, 1, 1) * m_cl               # left neighbour  h[p-1]
    d_p = pltpu.roll(h, L - 1, 1) * m_cr           # right neighbour h[p+1]
    d_0 = h

    def row_sum(shift, t0):
        if shift == 0:
            sm, s0, sp = d_m, d_0, d_p
        else:
            sm = pltpu.roll(d_m, shift, 1)         # XLU rotate (free-ish slot)
            s0 = pltpu.roll(d_0, shift, 1)
            sp = pltpu.roll(d_p, shift, 1)
        return taps[t0] * sm + taps[t0 + 1] * s0 + taps[t0 + 2] * sp

    acc = (row_sum(W, 0) * m_rt                    # row above  (a = -1)
           + row_sum(0, 3)                         # same row   (a =  0)
           + row_sum(L - W, 6) * m_rb)             # row below  (a = +1)
    acc = acc + b2
    acc = acc * jax.nn.sigmoid(acc)                # SiLU

    # --- 1x1 project conv (MXU) + folded-BN bias (+ residual) ---
    out = jnp.dot(w3, acc.astype(w3.dtype), preferred_element_type=jnp.float32)
    out = out + b3
    if use_res:                                    # static: stride==1 and inp==oup
        out = out + x.astype(jnp.float32)
    o_ref[0] = out.astype(o_ref.dtype)


# ----------------------------------------------------------------------------
# Wrapper-side parameter folding / mask construction / tiling heuristics
# ----------------------------------------------------------------------------
def fold_bn(gamma, beta, mean, var, eps=BN_EPS):
    scale = gamma / jnp.sqrt(var + eps)
    bias = beta - mean * scale
    return scale, bias


def _edge_masks(H, W, batch_tile):
    """(4, batch_tile*H*W) 0/1 masks: [col b=-1, col b=+1, row a=-1, row a=+1].

    Tiled per image so lane-roll wraparound at image boundaries is zeroed.
    """
    r = np.arange(H * W) // W
    c = np.arange(H * W) % W
    m = np.stack([c >= 1, c <= W - 2, r >= 1, r <= H - 2]).astype(np.float32)
    return jnp.asarray(np.tile(m, (1, batch_tile)))


def _vmem_estimate(bt, Cin, Cout, Hd, HW, cmp_bytes):
    L = bt * HW
    blocks = 2 * bt * (Cin + Cout) * HW * 4        # double-buffered act in/out blocks
    live = 6 * Hd * L * cmp_bytes                  # h, d_m/d_p, row partials, acc
    consts = (Hd * Cin + Cout * Hd + 9 * Hd + 2 * Hd + Cout) * 4 + 8 * L * cmp_bytes
    return blocks + live + consts


def _pick_batch_tile(N, Cin, Cout, Hd, HW, cmp_bytes, vmem_cap):
    fits = [d for d in range(1, N + 1)
            if N % d == 0
            and _vmem_estimate(d, Cin, Cout, Hd, HW, cmp_bytes) <= int(0.8 * vmem_cap)]
    if not fits:
        return 1

    def score(d):
        grid = N // d
        return (grid >= 2,                 # never leave grid==1 (v7x 2nd TC, pipelining)
                (d * HW) % 128 == 0,       # lane-dense, unmasked stores
                min(grid, 8),              # pipelining / megacore depth
                d)                         # then amortize per-step overhead
    return max(fits, key=score)


def init_params(key, inp, oup, expansion=4):
    """Deterministic synthetic parameters, PyTorch layouts (OIHW convs)."""
    hidden = inp * expansion
    ks = jax.random.split(key, 6)

    def bn_params(k, c):
        k1, k2, k3, k4 = jax.random.split(k, 4)
        gamma = 1.0 + 0.1 * jax.random.normal(k1, (c,), jnp.float32)
        beta = 0.1 * jax.random.normal(k2, (c,), jnp.float32)
        mean = 0.1 * jax.random.normal(k3, (c,), jnp.float32)
        var = jnp.abs(jax.random.normal(k4, (c,), jnp.float32)) + 0.5
        return gamma, beta, mean, var

    return {
        "w1": 0.1 * jax.random.normal(ks[0], (hidden, inp, 1, 1), jnp.float32),
        "bn1": bn_params(ks[1], hidden),
        "wdw": 0.1 * jax.random.normal(ks[2], (hidden, 1, 3, 3), jnp.float32),
        "bn2": bn_params(ks[3], hidden),
        "w3": 0.1 * jax.random.normal(ks[4], (oup, hidden, 1, 1), jnp.float32),
        "bn3": bn_params(ks[5], oup),
    }


# ----------------------------------------------------------------------------
# Wrapper: NCHW in, NCHW out (matches the PyTorch module in eval mode)
# ----------------------------------------------------------------------------
def mv2block_forward(x_nchw, params, *, stride=1, batch_tile=None,
                     matmul_dtype=jnp.bfloat16, compute_dtype=None):
    assert stride == 1, "only stride=1 (default) is implemented"
    N, Cin, H, W = x_nchw.shape
    HW = H * W
    Hd = params["w1"].shape[0]
    Cout = params["w3"].shape[0]
    use_res = (stride == 1) and (Cin == Cout)

    if compute_dtype is None:
        compute_dtype = _default_compute_dtype()
    cmp_bytes = jnp.dtype(compute_dtype).itemsize
    vmem_cap = _vmem_budget_bytes()

    if batch_tile is None:
        batch_tile = _pick_batch_tile(N, Cin, Cout, Hd, HW, cmp_bytes, vmem_cap)
    assert N % batch_tile == 0, "batch_tile must divide the batch size"
    G = N // batch_tile
    L = batch_tile * HW

    # ---- fold BatchNorm scales into the conv weights (wrapper-side, free) ----
    s1, b1 = fold_bn(*params["bn1"])
    s2, b2 = fold_bn(*params["bn2"])
    s3, b3 = fold_bn(*params["bn3"])
    w1 = (params["w1"][:, :, 0, 0] * s1[:, None]).astype(matmul_dtype)   # (Hd, Cin)
    w3 = (params["w3"][:, :, 0, 0] * s3[:, None]).astype(matmul_dtype)   # (Cout, Hd)
    wdw = params["wdw"][:, 0, :, :] * s2[:, None, None]                  # (Hd, 3, 3)
    wdw_taps = jnp.transpose(wdw, (1, 2, 0)).reshape(9, Hd, 1).astype(compute_dtype)
    b1c = b1.reshape(Hd, 1)                                   # f32 (added to f32 acc)
    b2c = b2.reshape(Hd, 1).astype(compute_dtype)
    b3c = b3.reshape(Cout, 1)
    masks = _edge_masks(H, W, batch_tile).astype(compute_dtype)          # (4, L)

    # ---- activations: NCHW -> (G, Cin, batch_tile*HW) (channel-major per group;
    #      a free reshape when batch_tile == 1) ----
    x = x_nchw.reshape(G, batch_tile, Cin, HW)
    x = jnp.transpose(x, (0, 2, 1, 3)).reshape(G, Cin, L)

    kernel = functools.partial(_mv2_kernel, W=W, L=L, use_res=use_res,
                               compute_dtype=compute_dtype)

    # VMEM limit derived from the actual block sizes, capped per generation.
    est = _vmem_estimate(batch_tile, Cin, Cout, Hd, HW, cmp_bytes)
    vmem_limit = int(min(vmem_cap, max(2 * est + (4 << 20), 16 << 20)))

    out = pl.pallas_call(
        kernel,
        out_shape=jax.ShapeDtypeStruct((G, Cout, L), x_nchw.dtype),
        grid=(G,),
        in_specs=[
            pl.BlockSpec((1, Cin, L), lambda n: (n, 0, 0)),
            pl.BlockSpec((Hd, Cin), lambda n: (0, 0)),
            pl.BlockSpec((Hd, 1), lambda n: (0, 0)),
            pl.BlockSpec((9, Hd, 1), lambda n: (0, 0, 0)),
            pl.BlockSpec((Hd, 1), lambda n: (0, 0)),
            pl.BlockSpec((Cout, Hd), lambda n: (0, 0)),
            pl.BlockSpec((Cout, 1), lambda n: (0, 0)),
            pl.BlockSpec((4, L), lambda n: (0, 0)),
        ],
        out_specs=pl.BlockSpec((1, Cout, L), lambda n: (n, 0, 0)),
        compiler_params=pltpu.CompilerParams(
            dimension_semantics=("parallel",),
            vmem_limit_bytes=vmem_limit),
    )(x, w1, b1c, wdw_taps, b2c, w3, b3c, masks)

    # ---- back to NCHW ----
    out = out.reshape(G, Cout, batch_tile, HW)
    out = jnp.transpose(out, (0, 2, 1, 3)).reshape(N, Cout, H, W)
    return out


# ----------------------------------------------------------------------------
# Pure-JAX reference (NCHW, same semantics as the PyTorch module in eval mode)
# ----------------------------------------------------------------------------
def mv2block_reference(x, params, *, stride=1):
    def bn(h, gamma, beta, mean, var):
        g = gamma[None, :, None, None]
        b = beta[None, :, None, None]
        m = mean[None, :, None, None]
        v = var[None, :, None, None]
        return (h - m) / jnp.sqrt(v + BN_EPS) * g + b

    Cin = x.shape[1]
    Cout = params["w3"].shape[0]
    hidden = params["w1"].shape[0]
    dn = ("NCHW", "OIHW", "NCHW")

    h = lax.conv_general_dilated(x, params["w1"], (1, 1), "VALID",
                                 dimension_numbers=dn)
    h = bn(h, *params["bn1"])
    h = h * jax.nn.sigmoid(h)
    h = lax.conv_general_dilated(h, params["wdw"], (stride, stride),
                                 ((1, 1), (1, 1)), dimension_numbers=dn,
                                 feature_group_count=hidden)
    h = bn(h, *params["bn2"])
    h = h * jax.nn.sigmoid(h)
    h = lax.conv_general_dilated(h, params["w3"], (1, 1), "VALID",
                                 dimension_numbers=dn)
    h = bn(h, *params["bn3"])
    if stride == 1 and Cin == Cout:
        h = h + x
    return h


if __name__ == "__main__":
    key = jax.random.PRNGKey(0)
    k_x, k_p = jax.random.split(key)

    # Small shapes: batch=2, inp=oup=8 channels, 16x16 spatial, expansion=4.
    N, C, H, W = 2, 8, 16, 16
    x = jax.random.normal(k_x, (N, C, H, W), jnp.float32)
    params = init_params(k_p, inp=C, oup=C, expansion=4)

    ref = mv2block_reference(x, params, stride=1)

    # Default fast path: bf16 MXU operands, generation-dependent dw dtype.
    out = jax.block_until_ready(mv2block_forward(x, params, stride=1))
    assert out.shape == ref.shape == (N, C, H, W)
    assert jnp.allclose(out, ref, atol=5e-2, rtol=5e-2), (
        f"bf16 path max abs err {float(jnp.max(jnp.abs(out - ref)))}")

    # Strict all-f32 path: must match the f32 reference tightly.
    out32 = jax.block_until_ready(
        mv2block_forward(x, params, stride=1,
                         matmul_dtype=jnp.float32, compute_dtype=jnp.float32))
    assert jnp.allclose(out32, ref, atol=1e-4, rtol=1e-4), (
        f"f32 path max abs err {float(jnp.max(jnp.abs(out32 - ref)))}")

    print("KERNEL_OK")
</pallas_src>

<mosaic_0001>
module attributes {stable_mosaic.version = 11 : i64} {
  func.func @_mv2_kernel(%arg0: i32, %arg1: memref<1x8x256xf32, #tpu.memory_space<vmem>>, %arg2: memref<32x8xbf16, #tpu.memory_space<vmem>>, %arg3: memref<32x1xf32, #tpu.memory_space<vmem>>, %arg4: memref<9x32x1xf32, #tpu.memory_space<vmem>>, %arg5: memref<32x1xf32, #tpu.memory_space<vmem>>, %arg6: memref<8x32xbf16, #tpu.memory_space<vmem>>, %arg7: memref<8x1xf32, #tpu.memory_space<vmem>>, %arg8: memref<4x256xf32, #tpu.memory_space<vmem>>, %arg9: memref<1x8x256xf32, #tpu.memory_space<vmem>>) attributes {dimension_semantics = [#tpu.dimension_semantics<parallel>], iteration_bounds = array<i64: 2>, scalar_prefetch = 0 : i64, scratch_operands = 0 : i64, tpu.core_type = #tpu.core_type<tc>, window_params = [{transform_indices = @transform_0, window_bounds = array<i64: 1, 8, 256>}, {pipeline_mode = #tpu.pipeline_mode<synchronous>, transform_indices = @transform_1, window_bounds = array<i64: 32, 8>}, {pipeline_mode = #tpu.pipeline_mode<synchronous>, transform_indices = @transform_2, window_bounds = array<i64: 32, 1>}, {pipeline_mode = #tpu.pipeline_mode<synchronous>, transform_indices = @transform_3, window_bounds = array<i64: 9, 32, 1>}, {pipeline_mode = #tpu.pipeline_mode<synchronous>, transform_indices = @transform_4, window_bounds = array<i64: 32, 1>}, {pipeline_mode = #tpu.pipeline_mode<synchronous>, transform_indices = @transform_5, window_bounds = array<i64: 8, 32>}, {pipeline_mode = #tpu.pipeline_mode<synchronous>, transform_indices = @transform_6, window_bounds = array<i64: 8, 1>}, {pipeline_mode = #tpu.pipeline_mode<synchronous>, transform_indices = @transform_7, window_bounds = array<i64: 4, 256>}, {transform_indices = @transform_8, window_bounds = array<i64: 1, 8, 256>}]} {
    %c0 = arith.constant 0 : index
    %c0_0 = arith.constant 0 : index
    %c0_1 = arith.constant 0 : index
    %0 = vector.load %arg1[%c0, %c0_0, %c0_1] : memref<1x8x256xf32, #tpu.memory_space<vmem>>, vector<1x8x256xf32>
    %1 = vector.shape_cast %0 : vector<1x8x256xf32> to vector<8x256xf32>
    %c0_2 = arith.constant 0 : index
    %c0_3 = arith.constant 0 : index
    %2 = vector.load %arg2[%c0_2, %c0_3] : memref<32x8xbf16, #tpu.memory_space<vmem>>, vector<32x8xbf16>
    %c0_4 = arith.constant 0 : index
    %c0_5 = arith.constant 0 : index
    %3 = vector.load %arg6[%c0_4, %c0_5] : memref<8x32xbf16, #tpu.memory_space<vmem>>, vector<8x32xbf16>
    %c0_6 = arith.constant 0 : index
    %c0_7 = arith.constant 0 : index
    %4 = vector.load %arg3[%c0_6, %c0_7] : memref<32x1xf32, #tpu.memory_space<vmem>>, vector<32x1xf32>
    %c0_8 = arith.constant 0 : index
    %c0_9 = arith.constant 0 : index
    %5 = vector.load %arg5[%c0_8, %c0_9] : memref<32x1xf32, #tpu.memory_space<vmem>>, vector<32x1xf32>
    %c0_10 = arith.constant 0 : index
    %c0_11 = arith.constant 0 : index
    %6 = vector.load %arg7[%c0_10, %c0_11] : memref<8x1xf32, #tpu.memory_space<vmem>>, vector<8x1xf32>
    %c0_12 = arith.constant 0 : index
    %c0_13 = arith.constant 0 : index
    %c0_14 = arith.constant 0 : index
    %7 = vector.load %arg4[%c0_12, %c0_13, %c0_14] : memref<9x32x1xf32, #tpu.memory_space<vmem>>, vector<1x32x1xf32>
    %8 = vector.shape_cast %7 : vector<1x32x1xf32> to vector<32x1xf32>
    %c1 = arith.constant 1 : index
    %c0_15 = arith.constant 0 : index
    %c0_16 = arith.constant 0 : index
    %9 = vector.load %arg4[%c1, %c0_15, %c0_16] : memref<9x32x1xf32, #tpu.memory_space<vmem>>, vector<1x32x1xf32>
    %10 = vector.shape_cast %9 : vector<1x32x1xf32> to vector<32x1xf32>
    %c2 = arith.constant 2 : index
    %c0_17 = arith.constant 0 : index
    %c0_18 = arith.constant 0 : index
    %11 = vector.load %arg4[%c2, %c0_17, %c0_18] : memref<9x32x1xf32, #tpu.memory_space<vmem>>, vector<1x32x1xf32>
    %12 = vector.shape_cast %11 : vector<1x32x1xf32> to vector<32x1xf32>
    %c3 = arith.constant 3 : index
    %c0_19 = arith.constant 0 : index
    %c0_20 = arith.constant 0 : index
    %13 = vector.load %arg4[%c3, %c0_19, %c0_20] : memref<9x32x1xf32, #tpu.memory_space<vmem>>, vector<1x32x1xf32>
    %14 = vector.shape_cast %13 : vector<1x32x1xf32> to vector<32x1xf32>
    %c4 = arith.constant 4 : index
    %c0_21 = arith.constant 0 : index
    %c0_22 = arith.constant 0 : index
    %15 = vector.load %arg4[%c4, %c0_21, %c0_22] : memref<9x32x1xf32, #tpu.memory_space<vmem>>, vector<1x32x1xf32>
    %16 = vector.shape_cast %15 : vector<1x32x1xf32> to vector<32x1xf32>
    %c5 = arith.constant 5 : index
    %c0_23 = arith.constant 0 : index
    %c0_24 = arith.constant 0 : index
    %17 = vector.load %arg4[%c5, %c0_23, %c0_24] : memref<9x32x1xf32, #tpu.memory_space<vmem>>, vector<1x32x1xf32>
    %18 = vector.shape_cast %17 : vector<1x32x1xf32> to vector<32x1xf32>
    %c6 = arith.constant 6 : index
    %c0_25 = arith.constant 0 : index
    %c0_26 = arith.constant 0 : index
    %19 = vector.load %arg4[%c6, %c0_25, %c0_26] : memref<9x32x1xf32, #tpu.memory_space<vmem>>, vector<1x32x1xf32>
    %20 = vector.shape_cast %19 : vector<1x32x1xf32> to vector<32x1xf32>
    %c7 = arith.constant 7 : index
    %c0_27 = arith.constant 0 : index
    %c0_28 = arith.constant 0 : index
    %21 = vector.load %arg4[%c7, %c0_27, %c0_28] : memref<9x32x1xf32, #tpu.memory_space<vmem>>, vector<1x32x1xf32>
    %22 = vector.shape_cast %21 : vector<1x32x1xf32> to vector<32x1xf32>
    %c8 = arith.constant 8 : index
    %c0_29 = arith.constant 0 : index
    %c0_30 = arith.constant 0 : index
    %23 = vector.load %arg4[%c8, %c0_29, %c0_30] : memref<9x32x1xf32, #tpu.memory_space<vmem>>, vector<1x32x1xf32>
    %24 = vector.shape_cast %23 : vector<1x32x1xf32> to vector<32x1xf32>
    %c0_31 = arith.constant 0 : index
    %c0_32 = arith.constant 0 : index
    %25 = vector.load %arg8[%c0_31, %c0_32] : memref<4x256xf32, #tpu.memory_space<vmem>>, vector<1x256xf32>
    %c1_33 = arith.constant 1 : index
    %c0_34 = arith.constant 0 : index
    %26 = vector.load %arg8[%c1_33, %c0_34] : memref<4x256xf32, #tpu.memory_space<vmem>>, vector<1x256xf32>
    %c2_35 = arith.constant 2 : index
    %c0_36 = arith.constant 0 : index
    %27 = vector.load %arg8[%c2_35, %c0_36] : memref<4x256xf32, #tpu.memory_space<vmem>>, vector<1x256xf32>
    %c3_37 = arith.constant 3 : index
    %c0_38 = arith.constant 0 : index
    %28 = vector.load %arg8[%c3_37, %c0_38] : memref<4x256xf32, #tpu.memory_space<vmem>>, vector<1x256xf32>
    %29 = arith.truncf %1 : vector<8x256xf32> to vector<8x256xbf16>
    %cst = arith.constant dense<0.000000e+00> : vector<32x256xf32>
    %30 = tpu.matmul %2, %29, %cst {dimension_numbers = #tpu.dot_dimension_numbers<[1], [0], [0], [1], [0, 0, 1, 1], [], []>} : vector<32x8xbf16>, vector<8x256xbf16>, vector<32x256xf32> -> vector<32x256xf32>
    %31 = vector.broadcast %4 : vector<32x1xf32> to vector<32x256xf32>
    %32 = arith.addf %30, %31 : vector<32x256xf32>
    %33 = arith.negf %32 : vector<32x256xf32>
    %34 = math.exp %33 : vector<32x256xf32>
    %cst_39 = arith.constant 1.000000e+00 : f32
    %35 = vector.broadcast %cst_39 : f32 to vector<32x256xf32>
    %36 = arith.addf %35, %34 : vector<32x256xf32>
    %37 = arith.divf %35, %36 : vector<32x256xf32>
    %38 = arith.mulf %32, %37 : vector<32x256xf32>
    %c1_i32 = arith.constant 1 : i32
    %39 = tpu.dynamic_rotate %38 by %c1_i32 dim 1 : vector<32x256xf32>, i32 -> vector<32x256xf32>
    %40 = vector.broadcast %25 : vector<1x256xf32> to vector<32x256xf32>
    %41 = arith.mulf %39, %40 : vector<32x256xf32>
    %c255_i32 = arith.constant 255 : i32
    %42 = tpu.dynamic_rotate %38 by %c255_i32 dim 1 : vector<32x256xf32>, i32 -> vector<32x256xf32>
    %43 = vector.broadcast %26 : vector<1x256xf32> to vector<32x256xf32>
    %44 = arith.mulf %42, %43 : vector<32x256xf32>
    %c16_i32 = arith.constant 16 : i32
    %45 = tpu.dynamic_rotate %41 by %c16_i32 dim 1 : vector<32x256xf32>, i32 -> vector<32x256xf32>
    %c16_i32_40 = arith.constant 16 : i32
    %46 = tpu.dynamic_rotate %38 by %c16_i32_40 dim 1 : vector<32x256xf32>, i32 -> vector<32x256xf32>
    %c16_i32_41 = arith.constant 16 : i32
    %47 = tpu.dynamic_rotate %44 by %c16_i32_41 dim 1 : vector<32x256xf32>, i32 -> vector<32x256xf32>
    %48 = vector.broadcast %8 : vector<32x1xf32> to vector<32x256xf32>
    %49 = arith.mulf %48, %45 : vector<32x256xf32>
    %50 = vector.broadcast %10 : vector<32x1xf32> to vector<32x256xf32>
    %51 = arith.mulf %50, %46 : vector<32x256xf32>
    %52 = arith.addf %49, %51 : vector<32x256xf32>
    %53 = vector.broadcast %12 : vector<32x1xf32> to vector<32x256xf32>
    %54 = arith.mulf %53, %47 : vector<32x256xf32>
    %55 = arith.addf %52, %54 : vector<32x256xf32>
    %56 = vector.broadcast %27 : vector<1x256xf32> to vector<32x256xf32>
    %57 = arith.mulf %55, %56 : vector<32x256xf32>
    %58 = vector.broadcast %14 : vector<32x1xf32> to vector<32x256xf32>
    %59 = arith.mulf %58, %41 : vector<32x256xf32>
    %60 = vector.broadcast %16 : vector<32x1xf32> to vector<32x256xf32>
    %61 = arith.mulf %60, %38 : vector<32x256xf32>
    %62 = arith.addf %59, %61 : vector<32x256xf32>
    %63 = vector.broadcast %18 : vector<32x1xf32> to vector<32x256xf32>
    %64 = arith.mulf %63, %44 : vector<32x256xf32>
    %65 = arith.addf %62, %64 : vector<32x256xf32>
    %66 = arith.addf %57, %65 : vector<32x256xf32>
    %c240_i32 = arith.constant 240 : i32
    %67 = tpu.dynamic_rotate %41 by %c240_i32 dim 1 : vector<32x256xf32>, i32 -> vector<32x256xf32>
    %c240_i32_42 = arith.constant 240 : i32
    %68 = tpu.dynamic_rotate %38 by %c240_i32_42 dim 1 : vector<32x256xf32>, i32 -> vector<32x256xf32>
    %c240_i32_43 = arith.constant 240 : i32
    %69 = tpu.dynamic_rotate %44 by %c240_i32_43 dim 1 : vector<32x256xf32>, i32 -> vector<32x256xf32>
    %70 = vector.broadcast %20 : vector<32x1xf32> to vector<32x256xf32>
    %71 = arith.mulf %70, %67 : vector<32x256xf32>
    %72 = vector.broadcast %22 : vector<32x1xf32> to vector<32x256xf32>
    %73 = arith.mulf %72, %68 : vector<32x256xf32>
    %74 = arith.addf %71, %73 : vector<32x256xf32>
    %75 = vector.broadcast %24 : vector<32x1xf32> to vector<32x256xf32>
    %76 = arith.mulf %75, %69 : vector<32x256xf32>
    %77 = arith.addf %74, %76 : vector<32x256xf32>
    %78 = vector.broadcast %28 : vector<1x256xf32> to vector<32x256xf32>
    %79 = arith.mulf %77, %78 : vector<32x256xf32>
    %80 = arith.addf %66, %79 : vector<32x256xf32>
    %81 = vector.broadcast %5 : vector<32x1xf32> to vector<32x256xf32>
    %82 = arith.addf %80, %81 : vector<32x256xf32>
    %83 = arith.negf %82 : vector<32x256xf32>
    %84 = math.exp %83 : vector<32x256xf32>
    %cst_44 = arith.constant 1.000000e+00 : f32
    %85 = vector.broadcast %cst_44 : f32 to vector<32x256xf32>
    %86 = arith.addf %85, %84 : vector<32x256xf32>
    %87 = arith.divf %85, %86 : vector<32x256xf32>
    %88 = arith.mulf %82, %87 : vector<32x256xf32>
    %89 = arith.truncf %88 : vector<32x256xf32> to vector<32x256xbf16>
    %cst_45 = arith.constant dense<0.000000e+00> : vector<8x256xf32>
    %90 = tpu.matmul %3, %89, %cst_45 {dimension_numbers = #tpu.dot_dimension_numbers<[1], [0], [0], [1], [0, 0, 1, 1], [], []>} : vector<8x32xbf16>, vector<32x256xbf16>, vector<8x256xf32> -> vector<8x256xf32>
    %91 = vector.broadcast %6 : vector<8x1xf32> to vector<8x256xf32>
    %92 = arith.addf %90, %91 : vector<8x256xf32>
    %93 = arith.addf %92, %1 : vector<8x256xf32>
    %c0_46 = arith.constant 0 : index
    %c0_47 = arith.constant 0 : index
    %c0_48 = arith.constant 0 : index
    %94 = vector.load %arg9[%c0_46, %c0_47, %c0_48] : memref<1x8x256xf32, #tpu.memory_space<vmem>>, vector<1x8x256xf32>
    %95 = vector.shape_cast %94 : vector<1x8x256xf32> to vector<8x256xf32>
    %96 = vector.shape_cast %93 : vector<8x256xf32> to vector<1x8x256xf32>
    tpu.vector_store %arg9[%c0_46, %c0_47, %c0_48], %96 {strides = array<i32>} : memref<1x8x256xf32, #tpu.memory_space<vmem>>, vector<1x8x256xf32>,
    return
  }
  func.func @transform_0(%arg0: i32) -> (i32, i32, i32) {
    %c0_i32 = arith.constant 0 : i32
    %c0_i32_0 = arith.constant 0 : i32
    %c0_i32_1 = arith.constant 0 : i32
    return %arg0, %c0_i32, %c0_i32_0 : i32, i32, i32
  }
  func.func @transform_1(%arg0: i32) -> (i32, i32) {
    %c0_i32 = arith.constant 0 : i32
    %c0_i32_0 = arith.constant 0 : i32
    %c0_i32_1 = arith.constant 0 : i32
    return %c0_i32, %c0_i32_0 : i32, i32
  }
  func.func @transform_2(%arg0: i32) -> (i32, i32) {
    %c0_i32 = arith.constant 0 : i32
    %c0_i32_0 = arith.constant 0 : i32
    %c0_i32_1 = arith.constant 0 : i32
    return %c0_i32, %c0_i32_0 : i32, i32
  }
  func.func @transform_3(%arg0: i32) -> (i32, i32, i32) {
    %c0_i32 = arith.constant 0 : i32
    %c0_i32_0 = arith.constant 0 : i32
    %c0_i32_1 = arith.constant 0 : i32
    %c0_i32_2 = arith.constant 0 : i32
    return %c0_i32, %c0_i32_0, %c0_i32_1 : i32, i32, i32
  }
  func.func @transform_4(%arg0: i32) -> (i32, i32) {
    %c0_i32 = arith.constant 0 : i32
    %c0_i32_0 = arith.constant 0 : i32
    %c0_i32_1 = arith.constant 0 : i32
    return %c0_i32, %c0_i32_0 : i32, i32
  }
  func.func @transform_5(%arg0: i32) -> (i32, i32) {
    %c0_i32 = arith.constant 0 : i32
    %c0_i32_0 = arith.constant 0 : i32
    %c0_i32_1 = arith.constant 0 : i32
    return %c0_i32, %c0_i32_0 : i32, i32
  }
  func.func @transform_6(%arg0: i32) -> (i32, i32) {
    %c0_i32 = arith.constant 0 : i32
    %c0_i32_0 = arith.constant 0 : i32
    %c0_i32_1 = arith.constant 0 : i32
    return %c0_i32, %c0_i32_0 : i32, i32
  }
  func.func @transform_7(%arg0: i32) -> (i32, i32) {
    %c0_i32 = arith.constant 0 : i32
    %c0_i32_0 = arith.constant 0 : i32
    %c0_i32_1 = arith.constant 0 : i32
    return %c0_i32, %c0_i32_0 : i32, i32
  }
  func.func @transform_8(%arg0: i32) -> (i32, i32, i32) {
    %c0_i32 = arith.constant 0 : i32
    %c0_i32_0 = arith.constant 0 : i32
    %c0_i32_1 = arith.constant 0 : i32
    return %arg0, %c0_i32, %c0_i32_0 : i32, i32, i32
  }
}

</mosaic_0001>

<bundles_post_ra>
// kernel: tpu_custom_call.1
= control target key start
LH: loop header
LB: loop body
LE: loop exit
PB: predicated region body
PF: predicated region fallthrough
CT: control target
= control target key end

     0   :  { %13 = vsyncpa [#allocation3], 0  ;;  %s2865_s0 = inlined_call_operand.vmem [shape: f32[2,8,256], index: 0, kind: input, shape index: {}]   ;;  %s2866_s1 = inlined_call_operand.vmem [shape: bf16[32,8], index: 1, kind: input, shape index: {}]   ;;  %s2867_s2 = inlined_call_operand.vmem [shape: f32[32,1], index: 2, kind: input, shape index: {}]   ;;  %s2868_s3 = inlined_call_operand.vmem [shape: f32[9,32,1], index: 3, kind: input, shape index: {}]   ;;  %s2869_s4 = inlined_call_operand.vmem [shape: f32[32,1], index: 4, kind: input, shape index: {}]   ;;  %s2870_s5 = inlined_call_operand.vmem [shape: bf16[8,32], index: 5, kind: input, shape index: {}]   ;;  %s2871_s6 = inlined_call_operand.vmem [shape: f32[8,1], index: 6, kind: input, shape index: {}]   ;;  %s2872_s7 = inlined_call_operand.vmem [shape: f32[4,256], index: 7, kind: input, shape index: {}]   ;;  %s2873_s8 = inlined_call_operand.hbm [shape: f32[2,8,256], index: 8, kind: output, shape index: {}]  }
   0x1   :  { %15 = vsyncpa [#allocation3 + $0x1], 0  ;;  %s1797_s27 = smov 0   ;;  %s1799_s28 = smov 0  }
   0x2   :  { %s1801_s29 = smov 0   ;;  %s1803_s30 = smov 0  }
   0x3 LB: > { %s1818_s9 = sadd.s32 4294967295, %s1745_s30   ;;  %s1489_s10 = sadd.s32 4294967294, %s1745_s30   ;;  %s1745_s30 = sphi %s1803_s30, %s2903_s30   ;;  %s1741_s29 = sphi %s1801_s29, %s2902_s29   ;;  %s1737_s28 = sphi %s1799_s28, %s2901_s28   ;;  %s1733_s27 = sphi %s1797_s27, %s2900_s27  }
   0x4   : > { %s1822_s11 = sadd.s32 1, %s1745_s30   ;;  %s201_s12 = sadd.s32 1, %s1741_s29 }
   0x5   : > { %s198_s13 = ssub.s32 %s1745_s30, %s1822_s11  ;;  %p211_p0 = scmp.ne.s32.totalorder %s1741_s29, %s1737_s28 }
   0x6   : > { %p199_p1 = scmp.eq.s32.totalorder %s198_s13, 0  ;;  %p212_p2 = scmp.eq.s32.totalorder %s1818_s9, 1 }
   0x7   : > { %p217_p3 = scmp.ne.s32.totalorder %s1737_s28, %s1733_s27  ;;  %p218_p4 = scmp.eq.s32.totalorder %s1489_s10, 1 }
   0x8   : > { %s1833_s14 = scalar_select %p199_p1, %s1741_s29, %s201_s12  }
   0x9   : > { %p1835_p5 = por %p212_p2, %p211_p0  ;;  %p1839_p6 = por %p218_p4, %p217_p3 }
   0xa   : > { %p1492_p7 = scmp.ge.s32.totalorder %s1745_s30, 1  ;;  %p265_p8 = scmp.lt.s32.totalorder %s1745_s30, 3 }
   0xc   : > { %p266_p9 = pnand %p1492_p7, %p265_p8 }
   0xd   : > { %p299_p10 = scmp.lt.s32.totalorder (!%p266_p9), %s1818_s9, 1  ;;  %s1748_s17 = smov (!%p266_p9), 127  }
   0xe   : > { %269 = sbr.rel (%p266_p9) target bundleno = 705 (0x2c1), region = 52  ;;  %s1749_s18 = smov (!%p266_p9), 1  }
   0xf   : > { %s1750_s19 = smov (!%p266_p9), 16   ;;  %s1751_s20 = smov (!%p266_p9), 112  }
  0x10   : > { %s296_s22 = sand.u32 (!%p266_p9), 1, %s1737_s28  }
  0x13   : > { %v314_v0 = vld [vmem:[%s2867_s2 + $0x10] sm:$0xff]  ;;  %v312_v1 = vld [vmem:[%s2867_s2] sm:$0xff]  ;;  %v1747_v3 = vmov 0   ;;  %s300_s23 = scalar_select %p299_p10, %s1818_s9, 1  ;;  %vm411_vm0 = vcmask 1043456   ;;  %v315_v6 = vld [vmem:[%s2867_s2 + $0x18] sm:$0xff] }
  0x14   : > { %v321_v2 = vld [vmem:[%s2868_s3] sm:$0xff]  ;;  %1615 = vset.pattern.permute.xlu1 %v1747_v3  ;;  %1614 = vset.pattern.permute.xlu0 %v1747_v3  ;;  %v313_v9 = vld [vmem:[%s2867_s2 + $0x8] sm:$0xff]  ;;  %v324_v12 = vld [vmem:[%s2868_s3 + $0x18] sm:$0xff]  ;;  %vm404_vm1 = vcmask 64512  }
  0x15   : > { %1616 = vset.pattern.permute.xlu2 %v1747_v3  ;;  %386 = vperm.xlu1 %1615, %v314_v0   ;;  %s1566_s24 = sshll.u32 %s300_s23, 4  ;;  %v1567_v13 = vld [vmem:[%s2866_s1] sm:$0xff]  ;;  %v323_v14 = vld [vmem:[%s2868_s3 + $0x10] sm:$0xff]  ;;  %v322_v15 = vld [vmem:[%s2868_s3 + $0x8] sm:$0xff]  ;;  %s1493_s23 = sshll.u32 %s296_s22, 4 }
  0x16   : > { %376 = vperm.xlu0 %1614, %v312_v1   ;;  %769 = vperm.xlu2 %1616, %v321_v2   ;;  %s1859_s10 = scalar_lea.vmem %s2865_s0, %s1566_s24  ;;  %v1498_v16 = vld [vmem:[%s2868_s3 + $0x30] sm:$0xff]  ;;  %v1497_v17 = vld [vmem:[%s2868_s3 + $0x28] sm:$0xff]  ;;  %v1496_v18 = vld [vmem:[%s2868_s3 + $0x20] sm:$0xff]  ;;  %s298_s12 = scalar_lea.vmem [#allocation2], %s1493_s23 }
  0x17   : > { %v305_v4 = vld [vmem:[%s1859_s10] sm:$0xff]  ;;  %v306_v5 = vld [vmem:[%s1859_s10 + $0x8] sm:$0xff]  ;;  %v1499_v22 = vld [vmem:[%s2868_s3 + $0x38] sm:$0xff]  ;;  %s1427_s13 = sshll.u32 %s298_s12, 4  ;;  %s1428_s13 = int_to_ptr.vmem [resolvable:$true] %s1427_s13 }
  0x18   : > { %v372_v7 = vpack.c.bf16 %v305_v4, %v305_v4  ;;  %v373_v8 = vpack.c.bf16 %v306_v5, %v306_v5  ;;  %v1501_v19 = vld [vmem:[%s2868_s3 + $0x48] sm:$0xff]  ;;  %v1500_v21 = vld [vmem:[%s2868_s3 + $0x40] sm:$0xff]  ;;  %v1503_v24 = vld [vmem:[%s2868_s3 + $0x58] sm:$0xff] }
  0x19   : > { %v1568_v20 = vld [vmem:[%s2866_s1 + $0x8] sm:$0xff]  ;;  %v1504_v23 = vld [vmem:[%s2868_s3 + $0x60] sm:$0xff]  ;;  %v1502_v25 = vld [vmem:[%s2868_s3 + $0x50] sm:$0xff] }
  0x1a   : > { %v413_v10 = vsel %vm411_vm0, %v372_v7, 0  ;;  %v416_v11 = vsel %vm411_vm0, %v373_v8, 0  ;;  %v1510_v26 = vld [vmem:[%s2868_s3 + $0x90] sm:$0xff]  ;;  %v1505_v28 = vld [vmem:[%s2868_s3 + $0x68] sm:$0xff]  ;;  %v1519_v29 = vld [vmem:[%s2868_s3 + $0xd8] sm:$0xff] }
  0x1b   : > { %425 = vmatpush.bf16.msra.mxu0 %v413_v10  ;;  %444 = vmatpush.bf16.msra.mxu1 %v416_v11  ;;  %v1506_v27 = vld [vmem:[%s2868_s3 + $0x70] sm:$0xff]  ;;  %v1507_v30 = vld [vmem:[%s2868_s3 + $0x78] sm:$0xff]  ;;  %v1516_v35 = vld [vmem:[%s2868_s3 + $0xc0] sm:$0xff] }
  0x1c   : > { %v1511_v31 = vld [vmem:[%s2868_s3 + $0x98] sm:$0xff]  ;;  %v1526_v32 = vld [vmem:[%s2868_s3 + $0x110] sm:$0xff]  ;;  %v1521_v38 = vld [vmem:[%s2868_s3 + $0xe8] sm:$0xff] }
  0x1d   : > { %391 = vperm.xlu1 %1615, %v315_v6   ;;  %v1518_v33 = vld [vmem:[%s2868_s3 + $0xd0] sm:$0xff]  ;;  %v1523_v36 = vld [vmem:[%s2868_s3 + $0xf8] sm:$0xff]  ;;  %v1513_v41 = vld [vmem:[%s2868_s3 + $0xa8] sm:$0xff] }
  0x1e   : > { %381 = vperm.xlu0 %1614, %v313_v9   ;;  %784 = vperm.xlu2 %1616, %v324_v12   ;;  %v1522_v34 = vld [vmem:[%s2868_s3 + $0xf0] sm:$0xff]  ;;  %v1515_v39 = vld [vmem:[%s2868_s3 + $0xb8] sm:$0xff]  ;;  %v1509_v42 = vld [vmem:[%s2868_s3 + $0x88] sm:$0xff] }
  0x1f   : > { %1539 = vmatmul.msk.bf16.vlgmr.msra.gmra.mxu0 %vm404_vm1, %v1567_v13  ;;  %1541 = vmatmul.msk.bf16.vlgmr.msra.gmra.mxu1 %vm404_vm1, %v1567_v13  ;;  %v1514_v37 = vld [vmem:[%s2868_s3 + $0xb0] sm:$0xff]  ;;  %v1527_v40 = vld [vmem:[%s2868_s3 + $0x118] sm:$0xff]  ;;  %v1508_v43 = vld [vmem:[%s2868_s3 + $0x80] sm:$0xff] }
  0x20   : > { %v1520_v44 = vld [vmem:[%s2868_s3 + $0xe0] sm:$0xff]  ;;  %v1517_v45 = vld [vmem:[%s2868_s3 + $0xc8] sm:$0xff] }
  0x21   : > { %v1512_v46 = vld [vmem:[%s2868_s3 + $0xa0] sm:$0xff] }
  0x25   : > { %779 = vperm.xlu1 %1615, %v323_v14  }
  0x26   : > { %774 = vperm.xlu0 %1614, %v322_v15   ;;  %807 = vperm.xlu2 %1616, %v1498_v16  }
  0x2d   : > { %802 = vperm.xlu1 %1615, %v1497_v17  }
  0x2e   : > { %797 = vperm.xlu0 %1614, %v1496_v18   ;;  %838 = vperm.xlu2 %1616, %v1501_v19  }
  0x2f   : > { %1540 = vmatmul.msk.bf16.gmra.mxu0 %vm404_vm1, %v1568_v20  ;;  %1542 = vmatmul.msk.bf16.gmra.mxu1 %vm404_vm1, %v1568_v20 }
  0x35   : > { %833 = vperm.xlu1 %1615, %v1500_v21  }
  0x36   : > { %812 = vperm.xlu0 %1614, %v1499_v22   ;;  %882 = vperm.xlu2 %1616, %v1504_v23  }
  0x3d   : > { %848 = vperm.xlu1 %1615, %v1503_v24  }
  0x3e   : > { %843 = vperm.xlu0 %1614, %v1502_v25   ;;  %920 = vperm.xlu2 %1616, %v1510_v26  }
  0x45   : > { %892 = vperm.xlu1 %1615, %v1506_v27  }
  0x46   : > { %887 = vperm.xlu0 %1614, %v1505_v28   ;;  %1078 = vperm.xlu2 %1616, %v1519_v29  }
  0x4d   : > { %897 = vperm.xlu1 %1615, %v1507_v30  }
  0x4e   : > { %925 = vperm.xlu0 %1614, %v1511_v31   ;;  %1137 = vperm.xlu2 %1616, %v1526_v32  }
  0x55   : > { %1073 = vperm.xlu1 %1615, %v1518_v33  }
  0x56   : > { %1101 = vperm.xlu0 %1614, %v1522_v34   ;;  %1063 = vperm.xlu2 %1616, %v1516_v35  }
  0x5d   : > { %1106 = vperm.xlu1 %1615, %v1523_v36  }
  0x5e   : > { %956 = vperm.xlu0 %1614, %v1514_v37   ;;  %1096 = vperm.xlu2 %1616, %v1521_v38  }
  0x65   : > { %961 = vperm.xlu1 %1615, %v1515_v39  }
  0x66   : > { %1142 = vperm.xlu0 %1614, %v1527_v40   ;;  %951 = vperm.xlu2 %1616, %v1513_v41  }
  0x6d   : > { %915 = vperm.xlu1 %1615, %v1509_v42  }
  0x6e   : > { %910 = vperm.xlu0 %1614, %v1508_v43  }
  0x70   : > { %v1984_v53 = vpop.permute.xlu2 %769 }
  0x75   : > { %1091 = vperm.xlu1 %1615, %v1520_v44  }
  0x76   : > { %1068 = vperm.xlu0 %1614, %v1517_v45  }
  0x78   : > { %v1996_v63 = vpop.permute.xlu2 %784 }
  0x7d   : > { %946 = vperm.xlu1 %1615, %v1512_v46  }
  0x80   : > { %v2014_v17 = vpop.permute.xlu2 %807 }
  0x87   : > { %v387_v47 = vpop.permute.xlu1 %386 }
  0x88   : > { %v377_v48 = vpop.permute.xlu0 %376 }
  0x8f   : > { %v1978_v49 = vpop.permute.xlu1 %391 }
  0x90   : > { %v382_v50 = vpop.permute.xlu0 %381 }
  0x97   : > { %v1980_v51 = vpop.permute.xlu1 %779 }
  0x98   : > { %v1982_v52 = vpop.permute.xlu0 %774 }
  0x9c   : > { %v427_v54 = vpop.f32.mrf.mxu0  ;;  %v446_v56 = vpop.f32.mrf.mxu1 }
  0x9d   : > { %v1986_v55 = vadd.f32 %v427_v54, %v377_v48  ;;  %v1988_v57 = vadd.f32 %v446_v56, %v377_v48 }
  0x9f   : > { %v1990_v58 = vpop.permute.xlu1 %802  ;;  %v1543_v59 = vmul.f32 -1.442695, %v1986_v55  ;;  %v1544_v61 = vmul.f32 -1.442695, %v1988_v57 }
  0xa0   : > { %v1993_v60 = vpop.permute.xlu0 %797 }
  0xa1   : > { %1617 = vpow2.f32 %v1543_v59 }
  0xa2   : > { %1619 = vpow2.f32 %v1544_v61 }
  0xa4   : > { %v429_v62 = vpop.f32.mrf.mxu0  ;;  %v448_v1 = vpop.f32.mrf.mxu1 }
  0xa5   : > { %v1998_v0 = vadd.f32 %v429_v62, %v382_v50  ;;  %v2000_v2 = vadd.f32 %v448_v1, %v382_v50 }
  0xa7   : > { %v2002_v3 = vpop.permute.xlu1 %833  ;;  %v1618_v4 = vpop.eup %1617  ;;  %v1545_v5 = vmul.f32 -1.442695, %v1998_v0  ;;  %v1546_v9 = vmul.f32 -1.442695, %v2000_v2 }
  0xa8   : > { %v2005_v6 = vpop.permute.xlu0 %812  ;;  %v1620_v7 = vpop.eup %1619  ;;  %v480_v8 = vadd.f32 1.0, %v1618_v4 }
  0xa9   : > { %v481_v10 = vadd.f32 1.0, %v1620_v7  ;;  %1621 = vpow2.f32 %v1545_v5 }
  0xaa   : > { %1623 = vrcp.f32 %v480_v8  ;;  %v497_v28 = vand.u32 2147483647, %v480_v8  ;;  %v499_v30 = vand.u32 2147483648, %v480_v8  ;;  %vm493_vm4 = vweird.f32 %v480_v8 }
  0xab   : > { %1625 = vrcp.f32 %v481_v10  ;;  %v512_v32 = vand.u32 2147483647, %v481_v10  ;;  %v514_v35 = vand.u32 2147483648, %v481_v10  ;;  %vm508_vm5 = vweird.f32 %v481_v10 }
  0xac   : > { %1627 = vpow2.f32 %v1546_v9  ;;  %v432_v11 = vpop.f32.mrf.mxu0  ;;  %v451_v13 = vpop.f32.mrf.mxu1  ;;  %vm498_vm7 = vcmp.eq.f32.partialorder %v497_v28, 8.507059e+37  ;;  %v500_v43 = vor.u32 1.1754944e-38, %v499_v30 }
  0xad   : > { %v2008_v12 = vadd.f32 %v432_v11, %v387_v47  ;;  %v2010_v14 = vadd.f32 %v451_v13, %v387_v47  ;;  %v2037_v47 = vpop.permute.xlu2 %838  ;;  %vm513_vm9 = vcmp.eq.f32.partialorder %v512_v32, 8.507059e+37  ;;  %v515_v50 = vor.u32 1.1754944e-38, %v514_v35 }
  0xaf   : > { %v2012_v15 = vpop.permute.xlu1 %848  ;;  %v1622_v16 = vpop.eup %1621  ;;  %v1547_v18 = vmul.f32 -1.442695, %v2008_v12  ;;  %v1548_v22 = vmul.f32 -1.442695, %v2010_v14 }
  0xb0   : > { %v2017_v19 = vpop.permute.xlu0 %843  ;;  %v1624_v20 = vpop.eup %1623  ;;  %v2019_v21 = vadd.f32 1.0, %v1622_v16 }
  0xb1   : > { %v1626_v23 = vpop.eup %1625  ;;  %v489_v24 = vmul.f32 %v1624_v20, %v480_v8  ;;  %1629 = vpow2.f32 %v1547_v18  ;;  %vm494_vm2 = vweird.f32 %v1624_v20 }
  0xb2   : > { %v1628_v25 = vpop.eup %1627  ;;  %v504_v26 = vmul.f32 %v1626_v23, %v481_v10  ;;  %1631 = vrcp.f32 %v2019_v21  ;;  %vm509_vm3 = vweird.f32 %v1626_v23  ;;  %vm495_vm6 = vmor %vm493_vm4, %vm494_vm2 }
  0xb3   : > { %v490_v27 = vsub.f32 1.0, %v489_v24  ;;  %v2023_v29 = vadd.f32 1.0, %v1628_v25  ;;  %1633 = vpow2.f32 %v1548_v22  ;;  %vm510_vm8 = vmor %vm508_vm5, %vm509_vm3  ;;  %vm523_vm5 = vweird.f32 %v2019_v21 }
  0xb4   : > { %v505_v31 = vsub.f32 1.0, %v504_v26  ;;  %v434_v33 = vpop.f32.mrf.mxu0  ;;  %v453_v41 = vpop.f32.mrf.mxu1 }
  0xb5   : > { %v491_v34 = vmul.f32 %v1624_v20, %v490_v27  ;;  %1635 = vrcp.f32 %v2023_v29  ;;  %v2029_v40 = vadd.f32 %v434_v33, %v1978_v49  ;;  %v2043_v62 = vadd.f32 %v453_v41, %v1978_v49  ;;  %v2073_v28 = vpop.permute.xlu2 %882 }
  0xb6   : > { %v506_v36 = vmul.f32 %v1626_v23, %v505_v31  ;;  %vm538_vm11 = vweird.f32 %v2023_v29 }
  0xb7   : > { %v2026_v37 = vpop.permute.xlu1 %892  ;;  %v1630_v38 = vpop.eup %1629  ;;  %v492_v39 = vadd.f32 %v1624_v20, %v491_v34  ;;  %v1549_v54 = vmul.f32 -1.442695, %v2029_v40 }
  0xb8   : > { %v2031_v42 = vpop.permute.xlu0 %887  ;;  %v507_v44 = vadd.f32 %v1626_v23, %v506_v36  ;;  %v2033_v45 = vadd.f32 1.0, %v1630_v38  ;;  %v2035_v46 = vpop.eup %1631 }
  0xb9   : > { %v496_v48 = vsel %vm495_vm6, %v1624_v20, %v492_v39  ;;  %v1634_v56 = vpop.eup %1633  ;;  %v519_v9 = vmul.f32 %v2035_v46, %v2019_v21  ;;  %v542_v20 = vand.u32 2147483647, %v2023_v29  ;;  %vm524_vm4 = vweird.f32 %v2035_v46 }
  0xba   : > { %v501_v59 = vsel %vm498_vm7, %v500_v43, %v496_v48  ;;  %v511_v61 = vsel %vm510_vm8, %v1626_v23, %v507_v44  ;;  %1637 = vrcp.f32 %v2033_v45  ;;  %v2054_v10 = vadd.f32 1.0, %v1634_v56  ;;  %vm2121_vm7 = vmor %vm523_vm5, %vm524_vm4 }
  0xbb   : > { %v1636_v1 = vpop.eup %1635  ;;  %v2046_v4 = vmul.f32 %v501_v59, %v1986_v55  ;;  %v516_v5 = vsel %vm513_vm9, %v515_v50, %v511_v61  ;;  %1639 = vpow2.f32 %v1549_v54  ;;  %v544_v55 = vand.u32 2147483648, %v2023_v29 }
  0xbc   : > { %v2049_v7 = vmul.f32 %v516_v5, %v1988_v57  ;;  %v534_v8 = vmul.f32 %v1636_v1, %v2023_v29  ;;  %v1550_v57 = vmul.f32 -1.442695, %v2043_v62  ;;  %1641 = vrcp.f32 %v2054_v10 }
  0xbd   : > { %656 = vrot.lane.b32.xlu0 %v2046_v4, %s1748_s17  ;;  %616 = vrot.lane.b32.xlu2 %v2046_v4, %s1749_s18  ;;  %vm539_vm10 = vweird.f32 %v1636_v1  ;;  %v520_v22 = vsub.f32 1.0, %v519_v9  ;;  %v545_v25 = vor.u32 1.1754944e-38, %v544_v55  ;;  %v559_v26 = vand.u32 2147483648, %v2033_v45 }
  0xbe   : > { %v535_v49 = vsub.f32 1.0, %v534_v8  ;;  %664 = vrot.lane.b32.xlu1 %v2049_v7, %s1748_s17  ;;  %1643 = vpow2.f32 %v1550_v57  ;;  %vm540_vm12 = vmor %vm538_vm11, %vm539_vm10  ;;  %vm553_vm13 = vweird.f32 %v2033_v45  ;;  %v557_v31 = vand.u32 2147483647, %v2033_v45 }
  0xbf   : > { %v2064_v11 = vpop.permute.xlu1 %897  ;;  %vm543_vm15 = vcmp.eq.f32.partialorder %v542_v20, 8.507059e+37  ;;  %v521_v29 = vmul.f32 %v2035_v46, %v520_v22  ;;  %v560_v43 = vor.u32 1.1754944e-38, %v559_v26  ;;  %vm568_vm2 = vweird.f32 %v2054_v10 }
  0xc0   : > { %v2067_v13 = vpop.permute.xlu0 %925  ;;  %v1638_v16 = vpop.eup %1637  ;;  %v536_v18 = vmul.f32 %v1636_v1, %v535_v49  ;;  %vm558_vm1 = vcmp.eq.f32.partialorder %v557_v31, 8.507059e+37  ;;  %v572_v56 = vand.u32 2147483647, %v2054_v10  ;;  %v529_v5 = vand.u32 2147483648, %v2019_v21 }
  0xc1   : > { %v549_v23 = vmul.f32 %v1638_v16, %v2033_v45  ;;  %v1640_v27 = vpop.eup %1639  ;;  %vm554_vm14 = vweird.f32 %v1638_v16  ;;  %v522_v61 = vadd.f32 %v2035_v46, %v521_v29  ;;  %v527_v49 = vand.u32 2147483647, %v2019_v21 }
  0xc2   : > { %v537_v24 = vadd.f32 %v1636_v1, %v536_v18  ;;  %v2077_v33 = vadd.f32 1.0, %v1640_v27  ;;  %v1642_v34 = vpop.eup %1641  ;;  %vm2085_vm0 = vmor %vm553_vm13, %vm554_vm14  ;;  %vm573_vm8 = vcmp.eq.f32.partialorder %v572_v56, 8.507059e+37 }
  0xc3   : > { %v550_v30 = vsub.f32 1.0, %v549_v23  ;;  %v564_v44 = vmul.f32 %v1642_v34, %v2054_v10  ;;  %vm569_vm3 = vweird.f32 %v1642_v34  ;;  %v921_v23 = vpop.permute.xlu2 %920  ;;  %vm528_vm9 = vcmp.eq.f32.partialorder %v527_v49, 8.507059e+37 }
  0xc4   : > { %v541_v32 = vsel %vm540_vm12, %v1636_v1, %v537_v24  ;;  %v1644_v38 = vpop.eup %1643  ;;  %1645 = vrcp.f32 %v2077_v33  ;;  %vm2117_vm6 = vmor %vm568_vm2, %vm569_vm3  ;;  %vm583_vm10 = vweird.f32 %v2077_v33 }
  0xc5   : > { %v546_v35 = vsel %vm543_vm15, %v545_v25, %v541_v32  ;;  %v551_v36 = vmul.f32 %v1638_v16, %v550_v30  ;;  %624 = vrot.lane.b32.xlu2 %v2049_v7, %s1749_s18  ;;  %v565_v54 = vsub.f32 1.0, %v564_v44  ;;  %v2100_v59 = vadd.f32 1.0, %v1644_v38 }
  0xc6   : > { %v2083_v39 = vmul.f32 %v546_v35, %v2000_v2  ;;  %719 = vrot.lane.b32.xlu1 %v2046_v4, %s1750_s19  ;;  %v574_v2 = vand.u32 2147483648, %v2054_v10  ;;  %v530_v10 = vor.u32 1.1754944e-38, %v529_v5  ;;  %v589_v35 = vand.u32 2147483648, %v2077_v33 }
  0xc7   : > { %v2093_v45 = vpop.permute.xlu1 %1073  ;;  %v552_v48 = vadd.f32 %v1638_v16, %v551_v36  ;;  %v566_v9 = vmul.f32 %v1642_v34, %v565_v54  ;;  %1647 = vrcp.f32 %v2100_v59  ;;  %vm598_vm14 = vweird.f32 %v2100_v59 }
  0xc8   : > { %v2097_v50 = vpop.permute.xlu0 %1101  ;;  %626 = vrot.lane.b32.xlu0 %v2083_v39, %s1749_s18 }
  0xc9   : > { %v556_v1 = vsel %vm2085_vm0, %v1638_v16, %v552_v48  ;;  %v575_v16 = vor.u32 1.1754944e-38, %v574_v2  ;;  %v567_v22 = vadd.f32 %v1642_v34, %v566_v9  ;;  %v604_v2 = vand.u32 2147483648, %v2100_v59 }
  0xca   : > { %v561_v8 = vsel %vm558_vm1, %v560_v43, %v556_v1  ;;  %v1646_v18 = vpop.eup %1645 }
  0xcb   : > { %v2113_v55 = vmul.f32 %v561_v8, %v2008_v12  ;;  %v526_v12 = vsel %vm2121_vm7, %v2035_v46, %v522_v61  ;;  %v579_v21 = vmul.f32 %v1646_v18, %v2077_v33  ;;  %v571_v24 = vsel %vm2117_vm6, %v1642_v34, %v567_v22 }
  0xcc   : > { %v576_v46 = vsel %vm573_vm8, %v575_v16, %v571_v24  ;;  %v531_v32 = vsel %vm528_vm9, %v530_v10, %v526_v12  ;;  %v587_v34 = vand.u32 2147483647, %v2077_v33  ;;  %vm584_vm11 = vweird.f32 %v1646_v18 }
  0xcd   : > { %727 = vrot.lane.b32.xlu2 %v2049_v7, %s1750_s19  ;;  %v2138_v26 = vmul.f32 %v921_v23, %v2113_v55  ;;  %v580_v27 = vsub.f32 1.0, %v579_v21  ;;  %v1648_v31 = vpop.eup %1647  ;;  %v613_v29 = vmul.f32 %v576_v46, %v2010_v14  ;;  %v610_v43 = vmul.f32 %v531_v32, %v1998_v0  ;;  %vm585_vm12 = vmor %vm583_vm10, %vm584_vm11  ;;  %v365_v46 = vld [vmem:[%s2872_s7] ss:$4 sm:$0x3] }
  0xce   : > { %1021 = vrot.lane.b32.xlu1 %v2049_v7, %s1751_s20  ;;  %v594_v38 = vmul.f32 %v1648_v31, %v2100_v59  ;;  %vm588_vm13 = vcmp.eq.f32.partialorder %v587_v34, 8.507059e+37  ;;  %v590_v14 = vor.u32 1.1754944e-38, %v589_v35  ;;  %vm599_vm15 = vweird.f32 %v1648_v31 }
  0xcf   : > { %v2135_v25 = vpop.permute.xlu1 %1106  ;;  %v581_v36 = vmul.f32 %v1646_v18, %v580_v27  ;;  %v2149_v41 = vmul.f32 %v921_v23, %v613_v29  ;;  %v602_v33 = vand.u32 2147483647, %v2100_v59  ;;  %vm600_vm0 = vmor %vm598_vm14, %vm599_vm15  ;;  %v605_v9 = vor.u32 1.1754944e-38, %v604_v2 }
  0xd0   : > { %v2140_v30 = vpop.permute.xlu0 %956  ;;  %729 = vrot.lane.b32.xlu0 %v2083_v39, %s1750_s19  ;;  %v595_v48 = vsub.f32 1.0, %v594_v38  ;;  %v632_v10 = vlaneseq  ;;  %v2220_v27 = vperm.slane %v365_v46, 0 }
  0xd1   : > { %v582_v44 = vadd.f32 %v1646_v18, %v581_v36  ;;  %vm603_vm1 = vcmp.eq.f32.partialorder %v602_v33, 8.507059e+37  ;;  %v1528_v33 = vld [vmem:[%s2872_s7 + $0x1] ss:$4 sm:$0x3] }
  0xd2   : > { %v596_v56 = vmul.f32 %v1648_v31, %v595_v48  ;;  %v2214_v24 = vand.u32 127, %v632_v10 }
  0xd3   : > { %v586_v54 = vsel %vm585_vm12, %v1646_v18, %v582_v44 }
  0xd4   : > { %v591_v61 = vsel %vm588_vm13, %v590_v14, %v586_v54  ;;  %v597_v5 = vadd.f32 %v1648_v31, %v596_v56  ;;  %vm634_vm2 = vcmp.lt.s32.totalorder %v2214_v24, 1  ;;  %vm672_vm3 = vcmp.lt.s32.totalorder %v2214_v24, 127 }
  0xd5   : > { %1013 = vrot.lane.b32.xlu2 %v2046_v4, %s1751_s20  ;;  %v614_v1 = vmul.f32 %v591_v61, %v2029_v40  ;;  %v2242_v61 = vperm.slane %v1528_v33, 0  ;;  %vm710_vm4 = vcmp.lt.s32.totalorder %v2214_v24, 16  ;;  %vm1004_vm5 = vcmp.lt.s32.totalorder %v2214_v24, 112 }
  0xd6   : > { %658 = vrot.lane.b32.xlu1 %v610_v43, %s1748_s17  ;;  %v601_v49 = vsel %vm600_vm0, %v1648_v31, %v597_v5  ;;  %v2222_v31 = vperm.slane %v365_v46, 1 }
  0xd7   : > { %v2158_v0 = vpop.permute.xlu1 %961  ;;  %v2165_v59 = vmul.f32 %v2067_v13, %v614_v1  ;;  %v606_v57 = vsel %vm603_vm1, %v605_v9, %v601_v49 }
  0xd8   : > { %v2161_v8 = vpop.permute.xlu0 %1142  ;;  %1015 = vrot.lane.b32.xlu0 %v610_v43, %s1751_s20  ;;  %v615_v16 = vmul.f32 %v606_v57, %v2043_v62 }
  0xda   : > { %v2169_v18 = vmul.f32 %v2067_v13, %v615_v16  ;;  %v2185_v13 = vpop.permute.xlu2 %1078 }
  0xdd   : > { %618 = vrot.lane.b32.xlu2 %v610_v43, %s1749_s18 }
  0xde   : > { %628 = vrot.lane.b32.xlu1 %v613_v29, %s1749_s18 }
  0xdf   : > { %v916_v40 = vpop.permute.xlu1 %915 }
  0xe0   : > { %v2173_v20 = vmul.f32 %v916_v40, %v610_v43  ;;  %v2176_v22 = vmul.f32 %v916_v40, %v2083_v39  ;;  %v911_v23 = vpop.permute.xlu0 %910  ;;  %620 = vrot.lane.b32.xlu0 %v2113_v55, %s1749_s18 }
  0xe1   : > { %v928_v12 = vmul.f32 %v911_v23, %v2046_v4  ;;  %v929_v62 = vmul.f32 %v911_v23, %v2049_v7 }
  0xe2   : > { %v2192_v21 = vpop.permute.xlu2 %1137 }
  0xe5   : > { %666 = vrot.lane.b32.xlu2 %v2083_v39, %s1748_s17 }
  0xe6   : > { %731 = vrot.lane.b32.xlu1 %v613_v29, %s1750_s19 }
  0xe7   : > { %v2224_v32 = vpop.permute.xlu1 %1091 }
  0xe8   : > { %668 = vrot.lane.b32.xlu0 %v613_v29, %s1748_s17  ;;  %v2236_v2 = vpop.permute.xlu0 %1068 }
  0xea   : > { %v2199_v4 = vpop.permute.xlu2 %1063 }
  0xed   : > { %721 = vrot.lane.b32.xlu2 %v610_v43, %s1750_s19 }
  0xee   : > { %622 = vrot.lane.b32.xlu1 %v614_v1, %s1749_s18 }
  0xef   : > { %v947_v56 = vpop.permute.xlu1 %946 }
  0xf0   : > { %723 = vrot.lane.b32.xlu0 %v2113_v55, %s1750_s19 }
  0xf2   : > { %v2205_v7 = vpop.permute.xlu2 %1096 }
  0xf5   : > { %1023 = vrot.lane.b32.xlu2 %v2083_v39, %s1751_s20 }
  0xf6   : > { %670 = vrot.lane.b32.xlu1 %v615_v16, %s1748_s17 }
  0xf8   : > { %1017 = vrot.lane.b32.xlu0 %v2113_v55, %s1751_s20 }
  0xfa   : > { %v2211_v39 = vpop.permute.xlu2 %951 }
  0xfd   : > { %660 = vrot.lane.b32.xlu2 %v2113_v55, %s1748_s17 }
  0xfe   : > { %725 = vrot.lane.b32.xlu1 %v614_v1, %s1750_s19 }
 0x100   : > { %662 = vrot.lane.b32.xlu0 %v614_v1, %s1748_s17 }
 0x105   : > { %1025 = vrot.lane.b32.xlu2 %v613_v29, %s1751_s20 }
 0x106   : > { %1019 = vrot.lane.b32.xlu1 %v614_v1, %s1751_s20  ;;  %v2244_v1 = vperm.slane %v1528_v33, 1 }
 0x108   : > { %1027 = vrot.lane.b32.xlu0 %v615_v16, %s1751_s20 }
 0x10d   : > { %630 = vrot.lane.b32.xlu2 %v615_v16, %s1749_s18 }
 0x115   : > { %733 = vrot.lane.b32.xlu2 %v615_v16, %s1750_s19 }
 0x117   : > { %v617_v55 = vpop.permute.xlu2 %616 }
 0x11f   : > { %v625_v29 = vpop.permute.xlu2 %624 }
 0x120   : > { %v635_v34 = vsel %vm634_vm2, %v617_v55, %v625_v29  ;;  %v639_v35 = vsel %vm634_vm2, %v625_v29, %v617_v55 }
 0x121   : > { %v648_v36 = vmul.f32 %v2220_v27, %v639_v35  ;;  %v649_v38 = vmul.f32 %v2222_v31, %v635_v34 }
 0x123   : > { %v900_v43 = vmul.f32 %v2073_v28, %v648_v36  ;;  %v901_v44 = vmul.f32 %v2073_v28, %v649_v38  ;;  %694 = vrot.lane.b32.xlu2 %v648_v36, %s1750_s19  ;;  %702 = vrot.lane.b32.xlu0 %v649_v38, %s1750_s19 }
 0x125   : > { %v936_v48 = vadd.f32 %v928_v12, %v900_v43  ;;  %v937_v14 = vadd.f32 %v929_v62, %v901_v44 }
 0x127   : > { %v728_v54 = vpop.permute.xlu2 %727 }
 0x12f   : > { %v657_v28 = vpop.permute.xlu0 %656  ;;  %v1014_v5 = vpop.permute.xlu2 %1013 }
 0x130   : > { %v665_v9 = vpop.permute.xlu1 %664 }
 0x131   : > { %v673_v49 = vsel %vm672_vm3, %v657_v28, %v665_v9  ;;  %v677_v57 = vsel %vm672_vm3, %v665_v9, %v657_v28 }
 0x132   : > { %v686_v16 = vmul.f32 %v2242_v61, %v673_v49  ;;  %v687_v40 = vmul.f32 %v2244_v1, %v677_v57 }
 0x134   : > { %v964_v23 = vmul.f32 %v947_v56, %v686_v16  ;;  %v965_v12 = vmul.f32 %v947_v56, %v687_v40  ;;  %751 = vrot.lane.b32.xlu1 %v687_v40, %s1750_s19  ;;  %1045 = vrot.lane.b32.xlu2 %v687_v40, %s1751_s20 }
 0x135   : > { %743 = vrot.lane.b32.xlu0 %v686_v16, %s1750_s19 }
 0x136   : > { %v2256_v62 = vadd.f32 %v964_v23, %v936_v48  ;;  %v2258_v10 = vadd.f32 %v965_v12, %v937_v14 }
 0x137   : > { %v619_v55 = vpop.permute.xlu2 %618 }
 0x138   : > { %v720_v46 = vpop.permute.xlu1 %719 }
 0x139   : > { %v2262_v29 = vsel %vm710_vm4, %v720_v46, %v728_v54  ;;  %v2266_v34 = vsel %vm710_vm4, %v728_v54, %v720_v46 }
 0x13a   : > { %v627_v35 = vpop.permute.xlu0 %626 }
 0x13b   : > { %v636_v43 = vsel %vm634_vm2, %v619_v55, %v627_v35  ;;  %v640_v44 = vsel %vm634_vm2, %v627_v35, %v619_v55 }
 0x13c   : > { %v650_v48 = vmul.f32 %v2220_v27, %v640_v44  ;;  %v651_v14 = vmul.f32 %v2222_v31, %v636_v43  ;;  %988 = vrot.lane.b32.xlu1 %v648_v36, %s1751_s20 }
 0x13d   : > { %996 = vrot.lane.b32.xlu0 %v649_v38, %s1751_s20 }
 0x13e   : > { %v902_v54 = vmul.f32 %v2031_v42, %v650_v48  ;;  %v903_v56 = vmul.f32 %v2031_v42, %v651_v14 }
 0x13f   : > { %v667_v33 = vpop.permute.xlu2 %666 }
 0x140   : > { %v1022_v28 = vpop.permute.xlu1 %1021  ;;  %v938_v9 = vadd.f32 %v2173_v20, %v902_v54  ;;  %v939_v49 = vadd.f32 %v2176_v22, %v903_v56 }
 0x141   : > { %v2283_v57 = vsel %vm1004_vm5, %v1014_v5, %v1022_v28  ;;  %v2287_v36 = vsel %vm1004_vm5, %v1022_v28, %v1014_v5 }
 0x142   : > { %v730_v38 = vpop.permute.xlu0 %729 }
 0x144   : > { %704 = vrot.lane.b32.xlu1 %v651_v14, %s1750_s19 }
 0x145   : > { %1037 = vrot.lane.b32.xlu0 %v686_v16, %s1751_s20 }
 0x147   : > { %v722_v42 = vpop.permute.xlu2 %721 }
 0x148   : > { %v659_v40 = vpop.permute.xlu1 %658  ;;  %v2293_v20 = vsel %vm710_vm4, %v722_v42, %v730_v38  ;;  %v2297_v22 = vsel %vm710_vm4, %v730_v38, %v722_v42 }
 0x149   : > { %v674_v23 = vsel %vm672_vm3, %v659_v40, %v667_v33  ;;  %v678_v5 = vsel %vm672_vm3, %v667_v33, %v659_v40 }
 0x14a   : > { %v688_v12 = vmul.f32 %v2242_v61, %v674_v23  ;;  %v689_v16 = vmul.f32 %v2244_v1, %v678_v5  ;;  %v1016_v55 = vpop.permute.xlu0 %1015 }
 0x14c   : > { %v966_v46 = vmul.f32 %v2211_v39, %v688_v12  ;;  %v967_v35 = vmul.f32 %v2211_v39, %v689_v16  ;;  %753 = vrot.lane.b32.xlu2 %v689_v16, %s1750_s19  ;;  %745 = vrot.lane.b32.xlu1 %v688_v12, %s1750_s19 }
 0x14d   : > { %696 = vrot.lane.b32.xlu0 %v650_v48, %s1750_s19 }
 0x14e   : > { %v2310_v43 = vadd.f32 %v966_v46, %v938_v9  ;;  %v2312_v44 = vadd.f32 %v967_v35, %v939_v49 }
 0x14f   : > { %v1024_v54 = vpop.permute.xlu2 %1023 }
 0x150   : > { %v629_v56 = vpop.permute.xlu1 %628  ;;  %v2316_v33 = vsel %vm1004_vm5, %v1016_v55, %v1024_v54  ;;  %v2320_v28 = vsel %vm1004_vm5, %v1024_v54, %v1016_v55 }
 0x152   : > { %v621_v39 = vpop.permute.xlu0 %620 }
 0x153   : > { %v637_v38 = vsel %vm634_vm2, %v621_v39, %v629_v56  ;;  %v641_v9 = vsel %vm634_vm2, %v629_v56, %v621_v39 }
 0x154   : > { %v652_v49 = vmul.f32 %v2220_v27, %v641_v9  ;;  %v653_v42 = vmul.f32 %v2222_v31, %v637_v38  ;;  %990 = vrot.lane.b32.xlu2 %v650_v48, %s1751_s20  ;;  %998 = vrot.lane.b32.xlu1 %v651_v14, %s1751_s20 }
 0x155   : > { %1047 = vrot.lane.b32.xlu0 %v689_v16, %s1751_s20 }
 0x156   : > { %v904_v40 = vmul.f32 %v2026_v37, %v652_v49  ;;  %v905_v23 = vmul.f32 %v2026_v37, %v653_v42 }
 0x157   : > { %v661_v5 = vpop.permute.xlu2 %660 }
 0x158   : > { %v940_v55 = vadd.f32 %v2138_v26, %v904_v40  ;;  %v941_v46 = vadd.f32 %v2149_v41, %v905_v23  ;;  %v732_v35 = vpop.permute.xlu1 %731 }
 0x15a   : > { %v669_v54 = vpop.permute.xlu0 %668 }
 0x15b   : > { %v675_v56 = vsel %vm672_vm3, %v661_v5, %v669_v54  ;;  %v679_v48 = vsel %vm672_vm3, %v669_v54, %v661_v5 }
 0x15c   : > { %v690_v14 = vmul.f32 %v2242_v61, %v675_v56  ;;  %v691_v16 = vmul.f32 %v2244_v1, %v679_v48  ;;  %706 = vrot.lane.b32.xlu2 %v653_v42, %s1750_s19  ;;  %1039 = vrot.lane.b32.xlu1 %v688_v12, %s1751_s20 }
 0x15e   : > { %v968_v37 = vmul.f32 %v2140_v30, %v690_v14  ;;  %v969_v26 = vmul.f32 %v2140_v30, %v691_v16  ;;  %755 = vrot.lane.b32.xlu0 %v691_v16, %s1750_s19 }
 0x15f   : > { %v1026_v41 = vpop.permute.xlu2 %1025 }
 0x160   : > { %v623_v39 = vpop.permute.xlu1 %622  ;;  %v2346_v38 = vadd.f32 %v968_v37, %v940_v55  ;;  %v2348_v9 = vadd.f32 %v969_v26, %v941_v46 }
 0x162   : > { %v724_v40 = vpop.permute.xlu0 %723 }
 0x163   : > { %v2352_v23 = vsel %vm710_vm4, %v724_v40, %v732_v35  ;;  %v2356_v12 = vsel %vm710_vm4, %v732_v35, %v724_v40 }
 0x164   : > { %698 = vrot.lane.b32.xlu1 %v652_v49, %s1750_s19  ;;  %747 = vrot.lane.b32.xlu2 %v690_v14, %s1750_s19 }
 0x167   : > { %v631_v30 = vpop.permute.xlu2 %630 }
 0x168   : > { %v671_v5 = vpop.permute.xlu1 %670  ;;  %v638_v55 = vsel %vm634_vm2, %v623_v39, %v631_v30  ;;  %v642_v46 = vsel %vm634_vm2, %v631_v30, %v623_v39 }
 0x169   : > { %v654_v54 = vmul.f32 %v2220_v27, %v642_v46  ;;  %v655_v56 = vmul.f32 %v2222_v31, %v638_v55 }
 0x16a   : > { %v1018_v48 = vpop.permute.xlu0 %1017 }
 0x16b   : > { %v2368_v35 = vsel %vm1004_vm5, %v1018_v48, %v1026_v41  ;;  %v2372_v37 = vsel %vm1004_vm5, %v1026_v41, %v1018_v48  ;;  %v906_v26 = vmul.f32 %v2064_v11, %v654_v54  ;;  %v907_v40 = vmul.f32 %v2064_v11, %v655_v56  ;;  %708 = vrot.lane.b32.xlu0 %v655_v56, %s1750_s19 }
 0x16c   : > { %1000 = vrot.lane.b32.xlu1 %v653_v42, %s1751_s20  ;;  %992 = vrot.lane.b32.xlu2 %v652_v49, %s1751_s20 }
 0x16d   : > { %v942_v27 = vadd.f32 %v2165_v59, %v906_v26  ;;  %v943_v31 = vadd.f32 %v2169_v18, %v907_v40 }
 0x16f   : > { %v734_v39 = vpop.permute.xlu2 %733 }
 0x170   : > { %v726_v30 = vpop.permute.xlu1 %725 }
 0x171   : > { %v2383_v41 = vsel %vm710_vm4, %v726_v30, %v734_v39  ;;  %v2387_v55 = vsel %vm710_vm4, %v734_v39, %v726_v30 }
 0x172   : > { %v663_v11 = vpop.permute.xlu0 %662 }
 0x173   : > { %v676_v42 = vsel %vm672_vm3, %v663_v11, %v671_v5  ;;  %v680_v49 = vsel %vm672_vm3, %v671_v5, %v663_v11 }
 0x174   : > { %v692_v59 = vmul.f32 %v2242_v61, %v676_v42  ;;  %v693_v18 = vmul.f32 %v2244_v1, %v680_v49  ;;  %1049 = vrot.lane.b32.xlu1 %v691_v16, %s1751_s20  ;;  %1041 = vrot.lane.b32.xlu2 %v690_v14, %s1751_s20  ;;  %v316_v14 = vld [vmem:[%s2869_s4] sm:$0xff]  ;;  %v815_v42 = vmul.f32 %v1993_v60, %v2266_v34 }
 0x175   : > { %v1524_v16 = vld [vmem:[%s2868_s3 + $0x100] sm:$0xff]  ;;  %v816_v49 = vmul.f32 %v1993_v60, %v2262_v29 }
 0x176   : > { %v970_v46 = vmul.f32 %v2158_v0, %v692_v59  ;;  %v971_v48 = vmul.f32 %v2158_v0, %v693_v18  ;;  %749 = vrot.lane.b32.xlu0 %v692_v59, %s1750_s19  ;;  %v1525_v0 = vld [vmem:[%s2868_s3 + $0x108] sm:$0xff]  ;;  %v1529_v60 = vld [vmem:[%s2872_s7 + $0x2] ss:$4 sm:$0x3] }
 0x178   : > { %v1020_v26 = vpop.permute.xlu1 %1019  ;;  %v2400_v40 = vadd.f32 %v970_v46, %v942_v27  ;;  %v2402_v39 = vadd.f32 %v971_v48, %v943_v31 }
 0x17a   : > { %v1028_v5 = vpop.permute.xlu0 %1027 }
 0x17b   : > { %v2406_v61 = vsel %vm1004_vm5, %v1020_v26, %v1028_v5  ;;  %v2410_v1 = vsel %vm1004_vm5, %v1028_v5, %v1020_v26  ;;  %v317_v26 = vld [vmem:[%s2869_s4 + $0x8] sm:$0xff]  ;;  %v320_v5 = vld [vmem:[%s2871_s6] sm:$0xff] }
 0x17c   : > { %757 = vrot.lane.b32.xlu1 %v693_v18, %s1750_s19  ;;  %700 = vrot.lane.b32.xlu2 %v654_v54, %s1750_s19 }
 0x17d   : > { %v695_v27 = vpop.permute.xlu2 %694 }
 0x17e   : > { %994 = vrot.lane.b32.xlu0 %v654_v54, %s1751_s20  ;;  %v318_v54 = vld [vmem:[%s2869_s4 + $0x10] sm:$0xff] }
 0x184   : > { %1132 = vperm.xlu1 %1615, %v1525_v0   ;;  %1002 = vrot.lane.b32.xlu2 %v655_v56, %s1751_s20  ;;  %v319_v56 = vld [vmem:[%s2869_s4 + $0x18] sm:$0xff] }
 0x186   : > { %1043 = vrot.lane.b32.xlu0 %v692_v59, %s1751_s20 }
 0x18c   : > { %1184 = vperm.xlu1 %1615, %v316_v14   ;;  %1051 = vrot.lane.b32.xlu2 %v693_v18, %s1751_s20  ;;  %s1569_s20 = sshll.u32 %s1818_s9, 4  ;;  %s1414_s9 = scalar_lea.sflag [#allocation3], %s296_s22 }
 0x18d   : > { %s1425_s26 = scalar_lea.hbm %s2873_s8, %s1569_s20  ;;  %s1703_s20 = scalar_lea.hbm %s2873_s8, 32 }
 0x18e   : > { %1127 = vperm.xlu0 %1614, %v1524_v16   ;;  %v1046_v0 = vpop.permute.xlu2 %1045  ;;  %s1429_s17 = sshll.u32 %s1425_s26, 4  ;;  %s1430_s17 = int_to_ptr.hbm [resolvable:$true] %s1429_s17 }
 0x18f   : > { %s1697_s18 = sshra.s32 %s1430_s17, 4  ;;  %s1698_s18 = int_to_ptr.hbm [resolvable:$true] %s1697_s18 }
 0x190   : > { %s1699_s19 = scalar_lea.hbm %s1698_s18, 16  ;;  %p1704_p0 = scmp.lt.s32.totalorder %s1698_s18, %s2873_s8 }
 0x191   : > { %p1700_p11 = scmp.ne.s32.totalorder %s1698_s18, %s1699_s19  ;;  %p1705_p1 = scmp.lt.s32.totalorder %s1703_s20, %s1699_s19 }
 0x193   : > { %p1701_p12 = pnand %p1700_p11, %p1835_p5  ;;  %p1706_p2 = por %p1705_p1, %p1704_p0 }
 0x194   : > { %1194 = vperm.xlu2 %1616, %v318_v54   ;;  %v2456_v54 = vperm.slane %v1529_v60, 0 }
 0x195   : > { %v703_v31 = vpop.permute.xlu0 %702  ;;  %p1702_p13 = pneg %p1701_p12 }
 0x196   : > { %1199 = vperm.xlu0 %1614, %v319_v56   ;;  %v711_v30 = vsel %vm710_vm4, %v695_v27, %v703_v31  ;;  %v715_v11 = vsel %vm710_vm4, %v703_v31, %v695_v27  ;;  %v2458_v56 = vperm.slane %v1529_v60, 1 }
 0x197   : > { %v787_v59 = vmul.f32 %v1984_v53, %v715_v11  ;;  %v788_v18 = vmul.f32 %v1984_v53, %v711_v30  ;;  %p1707_p3 = pnand %p1706_p2, %p1702_p13 }
 0x199   : > { %v823_v46 = vadd.f32 %v815_v42, %v787_v59  ;;  %v824_v48 = vadd.f32 %v816_v49, %v788_v18 }
 0x19c   : > { %1189 = vperm.xlu2 %1616, %v317_v26  }
 0x19e   : > { %1376 = vperm.xlu0 %1614, %v320_v5  }
 0x1a6   : > { %v752_v34 = vpop.permute.xlu1 %751  ;;  %v754_v29 = vpop.permute.xlu2 %753 }
 0x1a7   : > { %v744_v53 = vpop.permute.xlu0 %743 }
 0x1a8   : > { %v759_v14 = vsel %vm710_vm4, %v744_v53, %v752_v34  ;;  %v763_v16 = vsel %vm710_vm4, %v752_v34, %v744_v53 }
 0x1a9   : > { %v851_v27 = vmul.f32 %v2002_v3, %v763_v16  ;;  %v852_v31 = vmul.f32 %v2002_v3, %v759_v14 }
 0x1ab   : > { %v859_v30 = vadd.f32 %v851_v27, %v823_v46  ;;  %v860_v11 = vadd.f32 %v852_v31, %v824_v48  ;;  %v1109_v46 = vmul.f32 %v2224_v32, %v2283_v57  ;;  %v1110_v48 = vmul.f32 %v2224_v32, %v2287_v36 }
 0x1ad   : > { %v872_v42 = vmul.f32 %v2456_v54, %v859_v30  ;;  %v873_v49 = vmul.f32 %v2458_v56, %v860_v11 }
 0x1ae   : > { %v989_v59 = vpop.permute.xlu1 %988  ;;  %v991_v18 = vpop.permute.xlu2 %990 }
 0x1af   : > { %v2465_v26 = vadd.f32 %v2256_v62, %v872_v42  ;;  %v2468_v5 = vadd.f32 %v2258_v10, %v873_v49  ;;  %v997_v34 = vpop.permute.xlu0 %996 }
 0x1b0   : > { %v1005_v60 = vsel %vm1004_vm5, %v989_v59, %v997_v34  ;;  %v1009_v3 = vsel %vm1004_vm5, %v997_v34, %v989_v59  ;;  %v817_v34 = vmul.f32 %v1990_v58, %v2297_v22 }
 0x1b1   : > { %v1081_v53 = vmul.f32 %v2199_v4, %v1005_v60  ;;  %v1082_v62 = vmul.f32 %v2199_v4, %v1009_v3 }
 0x1b3   : > { %v2480_v14 = vadd.f32 %v1109_v46, %v1081_v53  ;;  %v2482_v10 = vadd.f32 %v1110_v48, %v1082_v62 }
 0x1b6   : > { %v705_v16 = vpop.permute.xlu1 %704  ;;  %v707_v27 = vpop.permute.xlu2 %706 }
 0x1b7   : > { %v1038_v31 = vpop.permute.xlu0 %1037 }
 0x1b8   : > { %v2486_v30 = vsel %vm1004_vm5, %v1038_v31, %v1046_v0  ;;  %v2490_v57 = vsel %vm1004_vm5, %v1046_v0, %v1038_v31  ;;  %v818_v0 = vmul.f32 %v1990_v58, %v2293_v20 }
 0x1be   : > { %v746_v32 = vpop.permute.xlu1 %745  ;;  %v748_v36 = vpop.permute.xlu2 %747 }
 0x1bf   : > { %v697_v11 = vpop.permute.xlu0 %696  ;;  %v760_v4 = vsel %vm710_vm4, %v746_v32, %v754_v29  ;;  %v764_v42 = vsel %vm710_vm4, %v754_v29, %v746_v32 }
 0x1c0   : > { %v712_v49 = vsel %vm710_vm4, %v697_v11, %v705_v16  ;;  %v716_v59 = vsel %vm710_vm4, %v705_v16, %v697_v11  ;;  %v853_v29 = vmul.f32 %v2037_v47, %v764_v42  ;;  %v854_v53 = vmul.f32 %v2037_v47, %v760_v4 }
 0x1c1   : > { %v789_v60 = vmul.f32 %v1982_v52, %v716_v59  ;;  %v790_v3 = vmul.f32 %v1982_v52, %v712_v49  ;;  %v1111_v11 = vmul.f32 %v2205_v7, %v2316_v33  ;;  %v1112_v47 = vmul.f32 %v2205_v7, %v2320_v28 }
 0x1c3   : > { %v825_v46 = vadd.f32 %v817_v34, %v789_v60  ;;  %v826_v48 = vadd.f32 %v818_v0, %v790_v3 }
 0x1c5   : > { %v861_v62 = vadd.f32 %v853_v29, %v825_v46  ;;  %v862_v31 = vadd.f32 %v854_v53, %v826_v48  ;;  %v819_v48 = vmul.f32 %v2014_v17, %v2356_v12  ;;  %v820_v29 = vmul.f32 %v2014_v17, %v2352_v23 }
 0x1c6   : > { %v999_v32 = vpop.permute.xlu1 %998  ;;  %v993_v16 = vpop.permute.xlu2 %992  ;;  %v1114_v12 = vmul.f32 %v2097_v50, %v2372_v37  ;;  %v821_v17 = vmul.f32 %v2005_v6, %v2387_v55 }
 0x1c7   : > { %v1006_v22 = vsel %vm1004_vm5, %v991_v18, %v999_v32  ;;  %v1010_v58 = vsel %vm1004_vm5, %v999_v32, %v991_v18  ;;  %v874_v20 = vmul.f32 %v2456_v54, %v861_v62  ;;  %v875_v52 = vmul.f32 %v2458_v56, %v862_v31  ;;  %v2526_v18 = vpop.permute.xlu0 %1047 }
 0x1c8   : > { %v1083_v4 = vmul.f32 %v2236_v2, %v1006_v22  ;;  %v1084_v42 = vmul.f32 %v2236_v2, %v1010_v58 }
 0x1c9   : > { %v2521_v49 = vadd.f32 %v2310_v43, %v874_v20  ;;  %v2524_v59 = vadd.f32 %v2312_v44, %v875_v52 }
 0x1ca   : > { %v2528_v34 = vadd.f32 %v1111_v11, %v1083_v4  ;;  %v2530_v0 = vadd.f32 %v1112_v47, %v1084_v42 }
 0x1ce   : > { %v2532_v33 = vpop.permute.xlu1 %1039  ;;  %v1042_v60 = vpop.permute.xlu2 %1041 }
 0x1d0   : > { %v756_v7 = vpop.permute.xlu0 %755 }
 0x1d1   : > { %v761_v2 = vsel %vm710_vm4, %v748_v36, %v756_v7  ;;  %v765_v43 = vsel %vm710_vm4, %v756_v7, %v748_v36 }
 0x1d2   : > { %v855_v31 = vmul.f32 %v2017_v19, %v765_v43  ;;  %v856_v36 = vmul.f32 %v2017_v19, %v761_v2 }
 0x1d6   : > { %v699_v28 = vpop.permute.xlu1 %698  ;;  %v701_v3 = vpop.permute.xlu2 %700 }
 0x1d7   : > { %v713_v44 = vsel %vm710_vm4, %v699_v28, %v707_v27  ;;  %v717_v46 = vsel %vm710_vm4, %v707_v27, %v699_v28  ;;  %v1113_v27 = vmul.f32 %v2097_v50, %v2368_v35 }
 0x1d8   : > { %v791_v53 = vmul.f32 %v1980_v51, %v717_v46  ;;  %v792_v62 = vmul.f32 %v1980_v51, %v713_v44  ;;  %v822_v51 = vmul.f32 %v2005_v6, %v2383_v41 }
 0x1da   : > { %v827_v32 = vadd.f32 %v819_v48, %v791_v53  ;;  %v828_v22 = vadd.f32 %v820_v29, %v792_v62 }
 0x1dc   : > { %v863_v58 = vadd.f32 %v855_v31, %v827_v32  ;;  %v864_v20 = vadd.f32 %v856_v36, %v828_v22 }
 0x1dd   : > { %v709_v23 = vpop.permute.xlu0 %708 }
 0x1de   : > { %v1001_v52 = vpop.permute.xlu1 %1000  ;;  %v714_v19 = vsel %vm710_vm4, %v701_v3, %v709_v23  ;;  %v718_v11 = vsel %vm710_vm4, %v709_v23, %v701_v3  ;;  %v1003_v47 = vpop.permute.xlu2 %1002  ;;  %v876_v35 = vmul.f32 %v2456_v54, %v863_v58  ;;  %v877_v4 = vmul.f32 %v2458_v56, %v864_v20 }
 0x1df   : > { %v1007_v50 = vsel %vm1004_vm5, %v993_v16, %v1001_v52  ;;  %v1011_v37 = vsel %vm1004_vm5, %v1001_v52, %v993_v16  ;;  %v793_v6 = vmul.f32 %v1996_v63, %v718_v11  ;;  %v794_v41 = vmul.f32 %v1996_v63, %v714_v19  ;;  %v1530_v16 = vld [vmem:[%s2872_s7 + $0x3] ss:$4 sm:$0x3] }
 0x1e0   : > { %v1085_v55 = vmul.f32 %v2093_v45, %v1007_v50  ;;  %v1086_v42 = vmul.f32 %v2093_v45, %v1011_v37  ;;  %v984_v7 = vadd.f32 %v2346_v38, %v876_v35  ;;  %v985_v28 = vadd.f32 %v2348_v9, %v877_v4 }
 0x1e1   : > { %v829_v3 = vadd.f32 %v821_v17, %v793_v6  ;;  %v830_v2 = vadd.f32 %v822_v51, %v794_v41  ;;  %v2583_v53 = vperm.slane %v1530_v16, 0  ;;  %v2585_v62 = vperm.slane %v1530_v16, 1 }
 0x1e2   : > { %v1121_v43 = vadd.f32 %v1113_v27, %v1085_v55  ;;  %v1122_v44 = vadd.f32 %v1114_v12, %v1086_v42  ;;  %v1115_v11 = vmul.f32 %v2135_v25, %v2406_v61  ;;  %v1116_v35 = vmul.f32 %v2135_v25, %v2410_v1 }
 0x1e6   : > { %v1050_v46 = vpop.permute.xlu1 %1049  ;;  %v1052_v48 = vpop.permute.xlu2 %1051 }
 0x1e7   : > { %v1055_v63 = vsel %vm1004_vm5, %v1042_v60, %v1050_v46  ;;  %v1059_v45 = vsel %vm1004_vm5, %v1050_v46, %v1042_v60 }
 0x1e8   : > { %v1149_v38 = vmul.f32 %v2192_v21, %v1055_v63  ;;  %v1150_v9 = vmul.f32 %v2192_v21, %v1059_v45  ;;  %v750_v29 = vpop.permute.xlu0 %749 }
 0x1ea   : > { %v1157_v31 = vadd.f32 %v1149_v38, %v1121_v43  ;;  %v1158_v36 = vadd.f32 %v1150_v9, %v1122_v44 }
 0x1ec   : > { %v1170_v32 = vmul.f32 %v2583_v53, %v1157_v31  ;;  %v1171_v22 = vmul.f32 %v2585_v62, %v1158_v36 }
 0x1ee   : > { %v758_v58 = vpop.permute.xlu1 %757  ;;  %v1178_v20 = vadd.f32 %v1170_v32, %v984_v7  ;;  %v1179_v27 = vadd.f32 %v1171_v22, %v985_v28  ;;  %v1195_v12 = vpop.permute.xlu2 %1194 }
 0x1ef   : > { %v762_v60 = vsel %vm710_vm4, %v750_v29, %v758_v58  ;;  %v766_v21 = vsel %vm710_vm4, %v758_v58, %v750_v29 }
 0x1f0   : > { %v857_v17 = vmul.f32 %v2012_v15, %v766_v21  ;;  %v858_v51 = vmul.f32 %v2012_v15, %v762_v60  ;;  %v995_v23 = vpop.permute.xlu0 %994  ;;  %v2595_v52 = vadd.f32 %v1195_v12, %v1178_v20  ;;  %v2597_v19 = vadd.f32 %v1195_v12, %v1179_v27 }
 0x1f1   : > { %v1008_v4 = vsel %vm1004_vm5, %v995_v23, %v1003_v47  ;;  %v1012_v50 = vsel %vm1004_vm5, %v1003_v47, %v995_v23  ;;  %v1054_v47 = vsel %vm1004_vm5, %v2532_v33, %v2526_v18 }
 0x1f2   : > { %v865_v37 = vadd.f32 %v857_v17, %v829_v3  ;;  %v866_v6 = vadd.f32 %v858_v51, %v830_v2  ;;  %v1087_v15 = vmul.f32 %v2185_v13, %v1008_v4  ;;  %v1088_v41 = vmul.f32 %v2185_v13, %v1012_v50 }
 0x1f3   : > { %v1555_v55 = vmul.f32 -1.442695, %v2595_v52  ;;  %v1556_v42 = vmul.f32 -1.442695, %v2597_v19  ;;  %v1058_v13 = vsel %vm1004_vm5, %v2526_v18, %v2532_v33 }
 0x1f4   : > { %v878_v61 = vmul.f32 %v2456_v54, %v865_v37  ;;  %v879_v25 = vmul.f32 %v2458_v56, %v866_v6  ;;  %v1123_v1 = vadd.f32 %v1115_v11, %v1087_v15  ;;  %v1124_v7 = vadd.f32 %v1116_v35, %v1088_v41 }
 0x1f5   : > { %1649 = vpow2.f32 %v1555_v55 }
 0x1f6   : > { %1651 = vpow2.f32 %v1556_v42  ;;  %v1133_v28 = vpop.permute.xlu1 %1132  ;;  %v986_v3 = vadd.f32 %v2400_v40, %v878_v61  ;;  %v987_v54 = vadd.f32 %v2402_v39, %v879_v25 }
 0x1f7   : > { %v1147_v56 = vmul.f32 %v1133_v28, %v1054_v47  ;;  %v1148_v2 = vmul.f32 %v1133_v28, %v1058_v13 }
 0x1f8   : > { %v1044_v43 = vpop.permute.xlu0 %1043 }
 0x1f9   : > { %v1155_v44 = vadd.f32 %v1147_v56, %v2528_v34  ;;  %v1156_v16 = vadd.f32 %v1148_v2, %v2530_v0  ;;  %v1056_v46 = vsel %vm1004_vm5, %v1044_v43, %v1052_v48  ;;  %v1060_v63 = vsel %vm1004_vm5, %v1052_v48, %v1044_v43  ;;  %v1190_v48 = vpop.permute.xlu2 %1189 }
 0x1fa   : > { %v1151_v18 = vmul.f32 %v2161_v8, %v1056_v46  ;;  %v1152_v33 = vmul.f32 %v2161_v8, %v1060_v63 }
 0x1fb   : > { %v1650_v40 = vpop.eup %1649  ;;  %v1168_v39 = vmul.f32 %v2583_v53, %v1155_v44  ;;  %v1169_v45 = vmul.f32 %v2585_v62, %v1156_v16 }
 0x1fc   : > { %v1652_v38 = vpop.eup %1651  ;;  %v2633_v9 = vadd.f32 1.0, %v1650_v40  ;;  %v1159_v34 = vadd.f32 %v1151_v18, %v1123_v1  ;;  %v1160_v0 = vadd.f32 %v1152_v33, %v1124_v7 }
 0x1fd   : > { %v2635_v29 = vadd.f32 1.0, %v1652_v38  ;;  %v1176_v31 = vadd.f32 %v1168_v39, %v2521_v49  ;;  %v1177_v24 = vadd.f32 %v1169_v45, %v2524_v59 }
 0x1fe   : > { %1653 = vrcp.f32 %v2633_v9  ;;  %v1172_v8 = vmul.f32 %v2583_v53, %v1159_v34  ;;  %v1173_v36 = vmul.f32 %v2585_v62, %v1160_v0  ;;  %v1185_v41 = vpop.permute.xlu1 %1184  ;;  %v1313_v44 = vand.u32 2147483648, %v2633_v9 }
 0x1ff   : > { %v2642_v32 = vadd.f32 %v1190_v48, %v1176_v31  ;;  %v2644_v22 = vadd.f32 %v1190_v48, %v1177_v24  ;;  %1655 = vrcp.f32 %v2635_v29  ;;  %vm1307_vm7 = vweird.f32 %v2633_v9 }
 0x200   : > { %v1128_v58 = vpop.permute.xlu0 %1127  ;;  %v1180_v20 = vadd.f32 %v1172_v8, %v986_v3  ;;  %v1181_v27 = vadd.f32 %v1173_v36, %v987_v54  ;;  %v1311_v63 = vand.u32 2147483647, %v2633_v9  ;;  %v1326_v18 = vand.u32 2147483647, %v2635_v29 }
 0x201   : > { %v1553_v49 = vmul.f32 -1.442695, %v2642_v32  ;;  %v1554_v59 = vmul.f32 -1.442695, %v2644_v22  ;;  %v1145_v12 = vmul.f32 %v1128_v58, %v2486_v30  ;;  %v1146_v60 = vmul.f32 %v1128_v58, %v2490_v57 }
 0x202   : > { %v1314_v31 = vor.u32 1.1754944e-38, %v1313_v44  ;;  %vm1322_vm10 = vweird.f32 %v2635_v29  ;;  %vm1312_vm11 = vcmp.eq.f32.partialorder %v1311_v63, 8.507059e+37  ;;  %vm2722_vm13 = vcmp.eq.f32.partialorder %v1326_v18, 8.507059e+37 }
 0x203   : > { %1657 = vpow2.f32 %v1553_v49  ;;  %v1153_v21 = vadd.f32 %v1145_v12, %v2480_v14  ;;  %v1154_v17 = vadd.f32 %v1146_v60, %v2482_v10 }
 0x204   : > { %v2653_v51 = vpop.eup %1653  ;;  %1659 = vpow2.f32 %v1554_v59 }
 0x205   : > { %v1166_v23 = vmul.f32 %v2583_v53, %v1153_v21  ;;  %v1167_v11 = vmul.f32 %v2585_v62, %v1154_v17  ;;  %v2657_v35 = vpop.eup %1655  ;;  %v1303_v4 = vmul.f32 %v2653_v51, %v2633_v9  ;;  %vm1308_vm6 = vweird.f32 %v2653_v51 }
 0x206   : > { %v1318_v53 = vmul.f32 %v2657_v35, %v2635_v29  ;;  %vm2703_vm8 = vmor %vm1307_vm7, %vm1308_vm6  ;;  %vm1323_vm9 = vweird.f32 %v2657_v35  ;;  %v1328_v9 = vand.u32 2147483648, %v2635_v29 }
 0x207   : > { %v1174_v30 = vadd.f32 %v1166_v23, %v2465_v26  ;;  %v1175_v57 = vadd.f32 %v1167_v11, %v2468_v5  ;;  %v1304_v5 = vsub.f32 1.0, %v1303_v4  ;;  %vm2718_vm12 = vmor %vm1322_vm10, %vm1323_vm9 }
 0x208   : > { %v1200_v50 = vpop.permute.xlu0 %1199  ;;  %v1319_v25 = vsub.f32 1.0, %v1318_v53  ;;  %v1329_v60 = vor.u32 1.1754944e-38, %v1328_v9 }
 0x209   : > { %v1658_v14 = vpop.eup %1657  ;;  %v2663_v37 = vadd.f32 %v1200_v50, %v1180_v20  ;;  %v2665_v10 = vadd.f32 %v1200_v50, %v1181_v27  ;;  %v2676_v42 = vadd.f32 %v1185_v41, %v1174_v30  ;;  %v2678_v61 = vadd.f32 %v1185_v41, %v1175_v57 }
 0x20a   : > { %v1660_v6 = vpop.eup %1659  ;;  %v2667_v15 = vadd.f32 1.0, %v1658_v14  ;;  %v1305_v1 = vmul.f32 %v2653_v51, %v1304_v5  ;;  %v1320_v28 = vmul.f32 %v2657_v35, %v1319_v25 }
 0x20b   : > { %v2671_v62 = vadd.f32 1.0, %v1660_v6  ;;  %v1557_v55 = vmul.f32 -1.442695, %v2663_v37  ;;  %v1558_v26 = vmul.f32 -1.442695, %v2665_v10 }
 0x20c   : > { %1661 = vrcp.f32 %v2667_v15  ;;  %v1551_v7 = vmul.f32 -1.442695, %v2676_v42  ;;  %v1552_v47 = vmul.f32 -1.442695, %v2678_v61  ;;  %v1306_v56 = vadd.f32 %v2653_v51, %v1305_v1 }
 0x20d   : > { %1663 = vrcp.f32 %v2671_v62  ;;  %v1321_v39 = vadd.f32 %v2657_v35, %v1320_v28  ;;  %v1283_v48 = vand.u32 2147483648, %v2667_v15  ;;  %v1298_v8 = vand.u32 2147483648, %v2671_v62 }
 0x20e   : > { %1665 = vpow2.f32 %v1557_v55  ;;  %v1310_v38 = vsel %vm2703_vm8, %v2653_v51, %v1306_v56  ;;  %vm1277_vm14 = vweird.f32 %v2667_v15  ;;  %v1281_v12 = vand.u32 2147483647, %v2667_v15 }
 0x20f   : > { %1667 = vpow2.f32 %v1558_v26  ;;  %v1315_v20 = vsel %vm1312_vm11, %v1314_v31, %v1310_v38  ;;  %v1325_v27 = vsel %vm2718_vm12, %v2657_v35, %v1321_v39  ;;  %vm1292_vm15 = vweird.f32 %v2671_v62 }
 0x210   : > { %1669 = vpow2.f32 %v1551_v7  ;;  %v1296_v17 = vand.u32 2147483647, %v2671_v62  ;;  %v1284_v23 = vor.u32 1.1754944e-38, %v1283_v48  ;;  %v2740_v11 = vor.u32 1.1754944e-38, %v1298_v8 }
 0x211   : > { %1671 = vpow2.f32 %v1552_v47  ;;  %v2743_v35 = vmul.f32 %v1315_v20, %v2595_v52  ;;  %v1330_v4 = vsel %vm2722_vm13, %v1329_v60, %v1325_v27  ;;  %vm2758_vm2 = vcmp.eq.f32.partialorder %v1281_v12, 8.507059e+37 }
 0x212   : > { %v2684_v13 = vpop.eup %1661  ;;  %v1367_v1 = vmul.f32 %v1330_v4, %v2597_v19  ;;  %vm2786_vm9 = vcmp.eq.f32.partialorder %v1296_v17, 8.507059e+37 }
 0x213   : > { %v2687_v3 = vpop.eup %1663  ;;  %v1273_v54 = vmul.f32 %v2684_v13, %v2667_v15  ;;  %vm1278_vm0 = vweird.f32 %v2684_v13 }
 0x214   : > { %v1666_v2 = vpop.eup %1665  ;;  %v1288_v43 = vmul.f32 %v2687_v3, %v2671_v62  ;;  %vm1293_vm1 = vweird.f32 %v2687_v3  ;;  %vm2767_vm5 = vmor %vm1277_vm14, %vm1278_vm0 }
 0x215   : > { %v1668_v16 = vpop.eup %1667  ;;  %v2696_v46 = vadd.f32 1.0, %v1666_v2  ;;  %v1274_v45 = vsub.f32 1.0, %v1273_v54  ;;  %vm2782_vm8 = vmor %vm1292_vm15, %vm1293_vm1 }
 0x216   : > { %v2701_v33 = vadd.f32 1.0, %v1668_v16  ;;  %v1670_v34 = vpop.eup %1669  ;;  %v1289_v0 = vsub.f32 1.0, %v1288_v43 }
 0x217   : > { %1673 = vrcp.f32 %v2696_v46  ;;  %v1672_v24 = vpop.eup %1671  ;;  %v2729_v29 = vadd.f32 1.0, %v1670_v34  ;;  %v1275_v59 = vmul.f32 %v2684_v13, %v1274_v45  ;;  %v1341_v50 = vand.u32 2147483647, %v2696_v46 }
 0x218   : > { %1675 = vrcp.f32 %v2701_v33  ;;  %v2731_v49 = vadd.f32 1.0, %v1672_v24  ;;  %v1290_v21 = vmul.f32 %v2687_v3, %v1289_v0  ;;  %v1343_v14 = vand.u32 2147483648, %v2696_v46 }
 0x219   : > { %1677 = vrcp.f32 %v2729_v29  ;;  %v1276_v6 = vadd.f32 %v2684_v13, %v1275_v59  ;;  %v1356_v55 = vand.u32 2147483647, %v2701_v33  ;;  %v1358_v26 = vand.u32 2147483648, %v2701_v33 }
 0x21a   : > { %1679 = vrcp.f32 %v2731_v49  ;;  %v1291_v53 = vadd.f32 %v2687_v3, %v1290_v21  ;;  %vm1337_vm3 = vweird.f32 %v2696_v46  ;;  %vm1352_vm4 = vweird.f32 %v2701_v33 }
 0x21b   : > { %vm2771_vm7 = vcmp.eq.f32.partialorder %v1341_v50, 8.507059e+37  ;;  %v1344_v56 = vor.u32 1.1754944e-38, %v1343_v14  ;;  %v1280_v2 = vsel %vm2767_vm5, %v2684_v13, %v1276_v6  ;;  %vm2794_vm11 = vcmp.eq.f32.partialorder %v1356_v55, 8.507059e+37  ;;  %v311_v50 = vld [vmem:[%s2870_s5] sm:$0xf] }
 0x21c   : > { %v1295_v13 = vsel %vm2782_vm8, %v2687_v3, %v1291_v53  ;;  %v1359_v18 = vor.u32 1.1754944e-38, %v1358_v26  ;;  %vm1247_vm13 = vweird.f32 %v2729_v29  ;;  %v1251_v3 = vand.u32 2147483647, %v2729_v29  ;;  %v1681_v14 = vld [vmem:[%s1859_s10] sm:$0xff]  ;;  %v1682_v53 = vld [vmem:[%s1859_s10 + $0x8] sm:$0xff] }
 0x21d   : > { %v1674_v51 = vpop.eup %1673  ;;  %v1253_v9 = vand.u32 2147483648, %v2729_v29  ;;  %v1266_v8 = vand.u32 2147483647, %v2731_v49  ;;  %v1285_v27 = vsel %vm2758_vm2, %v1284_v23, %v1280_v2 }
 0x21e   : > { %v1676_v30 = vpop.eup %1675  ;;  %v1333_v57 = vmul.f32 %v1674_v51, %v2696_v46  ;;  %vm1338_vm6 = vweird.f32 %v1674_v51  ;;  %v1364_v23 = vmul.f32 %v1285_v27, %v2642_v32  ;;  %v1377_v32 = vpop.permute.xlu0 %1376 }
 0x21f   : > { %v1348_v52 = vmul.f32 %v1676_v30, %v2701_v33  ;;  %v1678_v7 = vpop.eup %1677  ;;  %vm1353_vm10 = vweird.f32 %v1676_v30  ;;  %vm1339_vm12 = vmor %vm1337_vm3, %vm1338_vm6  ;;  %v1268_v33 = vand.u32 2147483648, %v2731_v49  ;;  %vm1252_vm3 = vcmp.eq.f32.partialorder %v1251_v3, 8.507059e+37 }
 0x220   : > { %v1334_v41 = vsub.f32 1.0, %v1333_v57  ;;  %v1243_v44 = vmul.f32 %v1678_v7, %v2729_v29  ;;  %v1680_v16 = vpop.eup %1679  ;;  %vm1354_vm14 = vmor %vm1352_vm4, %vm1353_vm10  ;;  %vm1248_vm15 = vweird.f32 %v1678_v7  ;;  %vm1262_vm4 = vweird.f32 %v2731_v49 }
 0x221   : > { %v1349_v25 = vsub.f32 1.0, %v1348_v52  ;;  %v1258_v45 = vmul.f32 %v1680_v16, %v2731_v49  ;;  %vm1263_vm0 = vweird.f32 %v1680_v16  ;;  %vm1249_vm1 = vmor %vm1247_vm13, %vm1248_vm15  ;;  %vm1267_vm5 = vcmp.eq.f32.partialorder %v1266_v8, 8.507059e+37 }
 0x222   : > { %v1335_v28 = vmul.f32 %v1674_v51, %v1334_v41  ;;  %v1244_v39 = vsub.f32 1.0, %v1243_v44  ;;  %vm1264_vm2 = vmor %vm1262_vm4, %vm1263_vm0  ;;  %vm1379_vm6 = vcmask 261120  }
 0x223   : > { %v1350_v43 = vmul.f32 %v1676_v30, %v1349_v25  ;;  %v1259_v31 = vsub.f32 1.0, %v1258_v45 }
 0x224   : > { %v1336_v63 = vadd.f32 %v1674_v51, %v1335_v28  ;;  %v1245_v0 = vmul.f32 %v1678_v7, %v1244_v39 }
 0x225   : > { %v1351_v40 = vadd.f32 %v1676_v30, %v1350_v43  ;;  %v1260_v20 = vmul.f32 %v1680_v16, %v1259_v31 }
 0x226   : > { %v1340_v38 = vsel %vm1339_vm12, %v1674_v51, %v1336_v63  ;;  %v1246_v58 = vadd.f32 %v1678_v7, %v1245_v0  ;;  %v1269_v51 = vor.u32 1.1754944e-38, %v1268_v33 }
 0x227   : > { %v1345_v34 = vsel %vm2771_vm7, %v1344_v56, %v1340_v38  ;;  %v1355_v46 = vsel %vm1354_vm14, %v1676_v30, %v1351_v40  ;;  %v1261_v21 = vadd.f32 %v1680_v16, %v1260_v20 }
 0x228   : > { %v1368_v24 = vmul.f32 %v1345_v34, %v2663_v37  ;;  %v1360_v48 = vsel %vm2794_vm11, %v1359_v18, %v1355_v46  ;;  %v1254_v37 = vor.u32 1.1754944e-38, %v1253_v9  ;;  %v1250_v60 = vsel %vm1249_vm1, %v1678_v7, %v1246_v58 }
 0x229   : > { %v1369_v36 = vmul.f32 %v1360_v48, %v2665_v10  ;;  %v1300_v10 = vsel %vm2786_vm9, %v2740_v11, %v1295_v13 }
 0x22a   : > { %v1372_v59 = vpack.c.bf16 %v1368_v24, %v2743_v35  ;;  %v1255_v17 = vsel %vm1252_vm3, %v1254_v37, %v1250_v60  ;;  %v1265_v35 = vsel %vm1264_vm2, %v1680_v16, %v1261_v21  ;;  %v1365_v49 = vmul.f32 %v1300_v10, %v2644_v22 }
 0x22b   : > { %v1373_v12 = vpack.c.bf16 %v1369_v36, %v1367_v1  ;;  %v1362_v29 = vmul.f32 %v1255_v17, %v2676_v42  ;;  %v1270_v4 = vsel %vm1267_vm5, %v1269_v51, %v1265_v35 }
 0x22c   : > { %1389 = vmatpush.bf16.msra.mxu2 %v1372_v59  ;;  %v1363_v57 = vmul.f32 %v1270_v4, %v2678_v61 }
 0x22d   : > { %1402 = vmatpush.bf16.msra.mxu3 %v1373_v12  ;;  %v1370_v30 = vpack.c.bf16 %v1364_v23, %v1362_v29 }
 0x22e   : > { %v1371_v11 = vpack.c.bf16 %v1365_v49, %v1363_v57 }
 0x230   : > { %1390 = vmatpush.bf16.msra.mxu2 %v1370_v30 }
 0x231   : > { %1403 = vmatpush.bf16.msra.mxu3 %v1371_v11 }
 0x233   : > { %1559 = vmatmul.msk.bf16.vlgmr.msra.gmra.mxu2 %vm1379_vm6, %v311_v50 }
 0x234   : > { %1560 = vmatmul.msk.bf16.vlgmr.msra.gmra.mxu3 %vm1379_vm6, %v311_v50 }
 0x2b6   : > { %v1392_v22 = vpop.f32.mrf.mxu2 }
 0x2b7   : > { %v1393_v42 = vadd.f32 %v1392_v22, %v1377_v32  ;;  %v1405_v61 = vpop.f32.mrf.mxu3 }
 0x2b8   : > { %v1406_v52 = vadd.f32 %v1405_v61, %v1377_v32 }
 0x2b9   : > { %v1409_v6 = vadd.f32 %v1681_v14, %v1393_v42 }
 0x2ba   : > { %v1410_v41 = vadd.f32 %v1682_v53, %v1406_v52 }
 0x2bb   : > { %1411 = vst [vmem:[%s298_s12] sm:$0xff] %v1409_v6 }
 0x2bc   : > { %1412 = vst [vmem:[%s298_s12 + $0x8] sm:$0xff] %v1410_v41 }
 0x2be   : > { %v1394_v55 = vpop.f32.mrf.mxu2 }
 0x2bf   : > { %1710 = shalt.err (!%p1707_p3)
}
 0x2c0   : > { %1570 = dma.vmem_to_hbm [thread:$0]  (%p1835_p5), %s1428_s13, 256, %s1430_s17, %s1414_s9   ;;  %v1407_v26 = vpop.f32.mrf.mxu3 }
 0x2c1 PF: > { %p1576_p4 = scmp.ge.s32.totalorder %s1745_s30, 2  ;;  %s1441_s10 = sand.u32 1, %s1733_s27  }
 0x2c2   : > { %s1442_s22 = scalar_lea.sflag [#allocation3], %s1441_s10 }
 0x2c3   : > { %p1573_p7 = pnand %p1576_p4, %p1839_p6 }
 0x2c5   : > { %p1574_p8 = pneg %p1573_p7 }
 0x2c7   : > { %1728 = dma.done.wait (%p1574_p8), %s1442_s22, 256  }
 0x2c8   : > { %1730 = vsyncadd (%p1574_p8), %s1442_s22, 4294967040  ;;  %p18_p9 = scmp.ge.s32.totalorder %s1822_s11, 4   ;;  %s2900_s27 = smov %s1737_s28 }
 0x2c9   : > { %s2901_s28 = smov %s1741_s29  ;;  %s2902_s29 = smov %s1833_s14 }
 0x2ca   : > { %s2903_s30 = smov %s1822_s11  ;;  %20 = sbr.rel (!%p18_p9) target bundleno = 3 (0x3), region = 98 }
 0x2cf   :  { %1448 = vsyncpa [#allocation3], 1 }
 0x2d0   :  { %1450 = vsyncpa [#allocation3 + $0x1], 1 }

</bundles_post_ra>
